<compile_context>
chip_gen: v6e
topology: v6e:2x2x1
jax: 0.10.0
libtpu: 0.0.40
codegen_flags: <defaults>
</compile_context>

<pallas_src>
import jax
import jax.numpy as jnp
from jax.experimental import pallas as pl
from jax.experimental.pallas import tpu as pltpu

N_MOD = 3          # modalities (s, i, t)
D_PAD = 128        # per-modality padded feature lanes (last lane = bias const 1)
H_PAD = 64         # per-modality padded hidden lanes per branch (last = const 1)
DW = N_MOD * D_PAD # 384: width of X_blk / Y_blk / H and of W1_bd


# ----------------------------------------------------------------------------
# Pallas kernel: fully fused ExID forward (single invocation).
# ----------------------------------------------------------------------------
def exid_kernel(idx_ref, s_ref, i_ref, t_ref, p_ref, w1_ref, w2_ref,
                out_ref, xb, yb, ypb):
    bsz = xb.shape[0]
    dw = xb.shape[1]                      # == DW

    # X_blk init: zeros everywhere except the per-modality constant-1 bias lane
    lane = jax.lax.broadcasted_iota(jnp.int32, (bsz, dw), 1)
    xb[...] = jnp.where(lane % D_PAD == D_PAD - 1, 1.0, 0.0).astype(jnp.float32)
    yb[...] = jnp.zeros((bsz, dw), jnp.float32)
    # ypb is fully overwritten below; no init needed.

    idx1 = idx_ref[0]
    idx2 = idx_ref[1]

    # Expert gather + zero-pad into the block layout (n_exp is static -> unroll).
    for m, emb_ref in enumerate((s_ref, i_ref, t_ref)):
        emb = emb_ref[...]                             # (B, n_exp, d_m) f32
        n_exp, d_m = emb.shape[1], emb.shape[2]
        x_m = jnp.zeros((bsz, d_m), jnp.float32)
        y_m = jnp.zeros((bsz, d_m), jnp.float32)
        for e in range(n_exp):
            sel1 = (idx1 == e).astype(jnp.float32)     # scalar 0/1
            sel2 = (idx2 == e).astype(jnp.float32)
            emb_e = emb[:, e, :]
            x_m = x_m + emb_e * sel1
            y_m = y_m + emb_e * sel2
        base = m * D_PAD
        xb[:, base:base + d_m] = x_m
        yb[:, base:base + d_m] = y_m

    # Batch permutation y_perm = P @ y, one tiny dot per 128-lane modality
    # block (permutation of zero-padded lanes stays zero).
    for m in range(N_MOD):
        base = m * D_PAD
        ypb[:, base:base + D_PAD] = jnp.dot(
            p_ref[m], yb[:, base:base + D_PAD],
            preferred_element_type=jnp.float32)

    # Two fused MXU matmuls cover all 3 modalities and both mu/lv branches;
    # biases are folded into the weights via the constant-1 lanes.
    x_bf = xb[...].astype(jnp.bfloat16)
    h = jnp.dot(x_bf, w1_ref[...], preferred_element_type=jnp.float32)
    h = jnp.maximum(h, 0.0)                                        # (B, 384)
    o = jnp.dot(h.astype(jnp.bfloat16), w2_ref[...],
                preferred_element_type=jnp.float32)                # (B, 768)
    mu = o[:, :dw]
    lv = jnp.tanh(o[:, dw:])

    y = yb[...]
    yp = ypb[...]
    # pos - neg = ((mu - y_perm)^2 - (mu - y)^2) * exp(-lv); padded lanes == 0
    diff = ((mu - yp) ** 2 - (mu - y) ** 2) * jnp.exp(-lv)
    # loss = mean over 3 modalities of mean_b(sum_d diff) / 2
    out_ref[0, 0] = jnp.sum(diff) / (bsz * 2.0 * N_MOD)


def exid_pallas(idx, s_embs, i_embs, t_embs, pmat, w1, w2):
    bsz = s_embs.shape[0]
    dw = w1.shape[0]

    flops = 2 * bsz * (dw * dw + dw * 2 * dw) + 2 * N_MOD * bsz * bsz * D_PAD
    transcendentals = 2 * bsz * dw
    bytes_accessed = (4 * (s_embs.size + i_embs.size + t_embs.size + pmat.size)
                      + 2 * (w1.size + w2.size) + 4)

    out = pl.pallas_call(
        exid_kernel,
        out_shape=jax.ShapeDtypeStruct((1, 1), jnp.float32),
        grid_spec=pltpu.PrefetchScalarGridSpec(
            num_scalar_prefetch=1,
            grid=(1,),
            in_specs=[
                pl.BlockSpec(s_embs.shape, lambda i, sp: (0, 0, 0)),
                pl.BlockSpec(i_embs.shape, lambda i, sp: (0, 0, 0)),
                pl.BlockSpec(t_embs.shape, lambda i, sp: (0, 0, 0)),
                pl.BlockSpec(pmat.shape, lambda i, sp: (0, 0, 0)),
                pl.BlockSpec(w1.shape, lambda i, sp: (0, 0)),
                pl.BlockSpec(w2.shape, lambda i, sp: (0, 0)),
            ],
            out_specs=pl.BlockSpec((1, 1), lambda i, sp: (0, 0),
                                   memory_space=pltpu.MemorySpace.SMEM),
            scratch_shapes=[
                pltpu.VMEM((bsz, dw), jnp.float32),   # X_blk
                pltpu.VMEM((bsz, dw), jnp.float32),   # Y_blk
                pltpu.VMEM((bsz, dw), jnp.float32),   # Y_perm_blk
            ],
        ),
        compiler_params=pltpu.CompilerParams(
            dimension_semantics=("arbitrary",)),
        cost_estimate=pl.CostEstimate(flops=flops,
                                      transcendentals=transcendentals,
                                      bytes_accessed=bytes_accessed),
    )(idx, s_embs, i_embs, t_embs, pmat, w1, w2)
    return out[0, 0]   # scalar ExID loss


# ----------------------------------------------------------------------------
# Parameter construction (PyTorch-Linear-style uniform init) and packing.
# Raw weights stored (in_features, out_features); biases (1, out_features).
# ----------------------------------------------------------------------------
def _linear_params(key, in_dim, out_dim):
    kw, kb = jax.random.split(key)
    bound = 1.0 / jnp.sqrt(jnp.float32(in_dim))
    w = jax.random.uniform(kw, (in_dim, out_dim), jnp.float32, -bound, bound)
    b = jax.random.uniform(kb, (1, out_dim), jnp.float32, -bound, bound)
    return w, b


def make_club_params(key, x_dim, y_dim, m_dim):
    h = m_dim // 2
    k = jax.random.split(key, 4)
    w1m, b1m = _linear_params(k[0], x_dim, h)
    w2m, b2m = _linear_params(k[1], h, y_dim)
    w1l, b1l = _linear_params(k[2], x_dim, h)
    w2l, b2l = _linear_params(k[3], h, y_dim)
    return (w1m, b1m, w2m, b2m, w1l, b1l, w2l, b2l)


def pack_exid_params(params_list):
    """Block-diagonal, bias-folded, bf16 packed weights for the fused kernel.

    Per-modality input block (128 lanes):  [x (x_dim) | 0-pad | 1.0]
    Per-modality hidden block (128 lanes): [mu-h (h) | 0 | 1.0][lv-h (h) | 0 | 1.0]
    Output columns: mu_s|mu_i|mu_t in [0, 384), lv_s|lv_i|lv_t in [384, 768);
    per-modality output block = [y (y_dim) | 0-pad].  (ExID uses
    x_dim == y_dim == embedding dim per modality.)
    """
    assert len(params_list) == N_MOD
    w1_bd = jnp.zeros((DW, DW), jnp.float32)
    w2_bd = jnp.zeros((DW, 2 * DW), jnp.float32)
    for m, (w1m, b1m, w2m, b2m, w1l, b1l, w2l, b2l) in enumerate(params_list):
        x_dim, h = w1m.shape
        y_dim = w2m.shape[1]
        assert x_dim <= D_PAD - 1, "need a free input lane for the bias fold"
        assert h <= H_PAD - 1, "need a free hidden lane for the bias fold"
        assert y_dim <= D_PAD

        r0 = m * D_PAD                   # input-lane base (rows of W1)
        bias_row = r0 + D_PAD - 1        # constant-1 input lane
        c_mu = m * 2 * H_PAD             # mu-hidden column base
        c_lv = c_mu + H_PAD              # lv-hidden column base
        c1_mu = c_mu + H_PAD - 1         # constant-1 hidden lane (mu branch)
        c1_lv = c_lv + H_PAD - 1         # constant-1 hidden lane (lv branch)
        o_mu = m * D_PAD                 # mu output column base
        o_lv = DW + m * D_PAD            # lv output column base

        w1_bd = (w1_bd
                 .at[r0:r0 + x_dim, c_mu:c_mu + h].set(w1m)
                 .at[bias_row, c_mu:c_mu + h].set(b1m[0])
                 .at[r0:r0 + x_dim, c_lv:c_lv + h].set(w1l)
                 .at[bias_row, c_lv:c_lv + h].set(b1l[0])
                 .at[bias_row, c1_mu].set(1.0)
                 .at[bias_row, c1_lv].set(1.0))
        w2_bd = (w2_bd
                 .at[c_mu:c_mu + h, o_mu:o_mu + y_dim].set(w2m)
                 .at[c1_mu, o_mu:o_mu + y_dim].set(b2m[0])
                 .at[c_lv:c_lv + h, o_lv:o_lv + y_dim].set(w2l)
                 .at[c1_lv, o_lv:o_lv + y_dim].set(b2l[0]))
    return w1_bd.astype(jnp.bfloat16), w2_bd.astype(jnp.bfloat16)


# ----------------------------------------------------------------------------
# ExID forward: one jitted graph, traced indices, one fused pallas_call.
# ----------------------------------------------------------------------------
@jax.jit
def exid_forward(embs, packed, rng_key):
    s_embs, i_embs, t_embs = embs
    w1, w2 = packed
    bsz, n_exp, _ = s_embs.shape

    k_exp, k_s, k_i, k_t = jax.random.split(rng_key, 4)
    # stand-in for random.sample(range(n_exp), k=2): two distinct indices
    exp_perm = jax.random.permutation(k_exp, n_exp)
    idx = exp_perm[:2].astype(jnp.int32)                  # (2,), traced

    # per-CLUB torch.randperm(batch) as tiny one-hot permutation matrices
    perms = jnp.stack([jax.random.permutation(k, bsz) for k in (k_s, k_i, k_t)])
    pmat = jax.nn.one_hot(perms, bsz, dtype=jnp.float32)  # (3, B, B)

    return exid_pallas(idx, s_embs, i_embs, t_embs, pmat, w1, w2)


# ----------------------------------------------------------------------------
# Reference (test-only).  Mirrors the kernel's numerics: bf16 MXU operands
# (x, h, weights, folded biases), f32 accumulation, f32 elementwise tail.
# ----------------------------------------------------------------------------
def _lin_bf16(v, w, b):
    return (jnp.dot(v.astype(jnp.bfloat16), w.astype(jnp.bfloat16),
                    preferred_element_type=jnp.float32)
            + b.astype(jnp.bfloat16).astype(jnp.float32))


def club_forward_ref(x, y, yp, params):
    (w1m, b1m, w2m, b2m, w1l, b1l, w2l, b2l) = params
    h_mu = jnp.maximum(_lin_bf16(x, w1m, b1m), 0.0)
    h_lv = jnp.maximum(_lin_bf16(x, w1l, b1l), 0.0)
    mu = _lin_bf16(h_mu, w2m, b2m)
    lv = jnp.tanh(_lin_bf16(h_lv, w2l, b2l))
    pos_v = -(mu - y) ** 2 / jnp.exp(lv)
    neg_v = -(mu - yp) ** 2 / jnp.exp(lv)
    return jnp.mean(jnp.sum(pos_v, -1) - jnp.sum(neg_v, -1)) / 2.0


def exid_forward_ref(embs, params_list, rng_key):
    s_embs, i_embs, t_embs = embs
    bsz, n_exp, _ = s_embs.shape
    k_exp, k_s, k_i, k_t = jax.random.split(rng_key, 4)
    exp_perm = jax.random.permutation(k_exp, n_exp)
    idx1, idx2 = int(exp_perm[0]), int(exp_perm[1])
    losses = []
    for embs_m, params, k_m in ((s_embs, params_list[0], k_s),
                                (i_embs, params_list[1], k_i),
                                (t_embs, params_list[2], k_t)):
        x = embs_m[:, idx1, :]
        y = embs_m[:, idx2, :]
        r_idx = jax.random.permutation(k_m, bsz)
        losses.append(club_forward_ref(x, y, y[r_idx, :], params))
    return (losses[0] + losses[1] + losses[2]) / 3.0


if __name__ == "__main__":
    # Small, module-consistent shapes.
    B = 8          # batch
    n_exp = 4      # number of experts
    s_e_dim, i_e_dim, t_e_dim = 32, 16, 32

    key = jax.random.PRNGKey(0)
    k_data, k_ps, k_pi, k_pt, k_fwd = jax.random.split(key, 5)

    kd = jax.random.split(k_data, 3)
    s_embs = jax.random.normal(kd[0], (B, n_exp, s_e_dim), jnp.float32)
    i_embs = jax.random.normal(kd[1], (B, n_exp, i_e_dim), jnp.float32)
    t_embs = jax.random.normal(kd[2], (B, n_exp, t_e_dim), jnp.float32)

    params_s = make_club_params(k_ps, s_e_dim, s_e_dim, s_e_dim)
    params_i = make_club_params(k_pi, i_e_dim, i_e_dim, i_e_dim)
    params_t = make_club_params(k_pt, t_e_dim, t_e_dim, t_e_dim)
    packed = pack_exid_params([params_s, params_i, params_t])

    embs = (s_embs, i_embs, t_embs)
    loss = jax.block_until_ready(exid_forward(embs, packed, k_fwd))

    loss_ref = jax.block_until_ready(
        exid_forward_ref(embs, [params_s, params_i, params_t], k_fwd))

    assert bool(jnp.isfinite(loss)), loss
    # Tolerance accounts for bf16 rounding-boundary effects between the fused
    # block-diagonal matmuls and the per-branch reference matmuls.
    assert jnp.allclose(loss, loss_ref, rtol=1e-2, atol=1e-2), (loss, loss_ref)
    print("KERNEL_OK")
</pallas_src>

<mosaic_0001>
module attributes {stable_mosaic.version = 11 : i64} {
  func.func @exid_kernel(%arg0: i32, %arg1: memref<2xi32, #tpu.memory_space<smem>>, %arg2: memref<8x4x32xf32, #tpu.memory_space<vmem>>, %arg3: memref<8x4x16xf32, #tpu.memory_space<vmem>>, %arg4: memref<8x4x32xf32, #tpu.memory_space<vmem>>, %arg5: memref<3x8x8xf32, #tpu.memory_space<vmem>>, %arg6: memref<384x384xbf16, #tpu.memory_space<vmem>>, %arg7: memref<384x768xbf16, #tpu.memory_space<vmem>>, %arg8: memref<1x1xf32, #tpu.memory_space<smem>>, %arg9: memref<8x384xf32, #tpu.memory_space<vmem>>, %arg10: memref<8x384xf32, #tpu.memory_space<vmem>>, %arg11: memref<8x384xf32, #tpu.memory_space<vmem>>) attributes {dimension_semantics = [#tpu.dimension_semantics<arbitrary>], iteration_bounds = array<i64: 1>, scalar_prefetch = 1 : i64, scratch_operands = 3 : i64, tpu.core_type = #tpu.core_type<tc>, window_params = [{pipeline_mode = #tpu.pipeline_mode<synchronous>, transform_indices = @transform_0, window_bounds = array<i64: 8, 4, 32>}, {pipeline_mode = #tpu.pipeline_mode<synchronous>, transform_indices = @transform_1, window_bounds = array<i64: 8, 4, 16>}, {pipeline_mode = #tpu.pipeline_mode<synchronous>, transform_indices = @transform_2, window_bounds = array<i64: 8, 4, 32>}, {pipeline_mode = #tpu.pipeline_mode<synchronous>, transform_indices = @transform_3, window_bounds = array<i64: 3, 8, 8>}, {pipeline_mode = #tpu.pipeline_mode<synchronous>, transform_indices = @transform_4, window_bounds = array<i64: 384, 384>}, {pipeline_mode = #tpu.pipeline_mode<synchronous>, transform_indices = @transform_5, window_bounds = array<i64: 384, 768>}, {transform_indices = @transform_6, window_bounds = array<i64: 1, 1>}]} {
    %0 = tpu.iota {dimensions = array<i32: 1>} : vector<8x384xi32>
    %c128_i32 = arith.constant 128 : i32
    %c0_i32 = arith.constant 0 : i32
    %1 = arith.cmpi eq, %c128_i32, %c0_i32 : i32
    %c1_i32 = arith.constant 1 : i32
    %2 = arith.select %1, %c1_i32, %c128_i32 : i32
    %3 = vector.broadcast %2 : i32 to vector<8x384xi32>
    %4 = arith.remsi %0, %3 : vector<8x384xi32>
    %c0_i32_0 = arith.constant 0 : i32
    %5 = vector.broadcast %c0_i32_0 : i32 to vector<8x384xi32>
    %6 = arith.cmpi ne, %4, %5 : vector<8x384xi32>
    %c0_i32_1 = arith.constant 0 : i32
    %7 = vector.broadcast %c0_i32_1 : i32 to vector<8x384xi32>
    %8 = arith.cmpi slt, %4, %7 : vector<8x384xi32>
    %c0_i32_2 = arith.constant 0 : i32
    %9 = arith.cmpi slt, %2, %c0_i32_2 : i32
    %10 = vector.broadcast %9 : i1 to vector<8x384xi1>
    %11 = vector.broadcast %10 : vector<8x384xi1> to vector<8x384xi1>
    %12 = arith.xori %8, %11 : vector<8x384xi1>
    %13 = arith.andi %12, %6 : vector<8x384xi1>
    %14 = vector.broadcast %2 : i32 to vector<8x384xi32>
    %15 = arith.addi %4, %14 : vector<8x384xi32>
    %16 = arith.select %13, %15, %4 : vector<8x384xi1>, vector<8x384xi32>
    %c127_i32 = arith.constant 127 : i32
    %17 = vector.broadcast %c127_i32 : i32 to vector<8x384xi32>
    %18 = arith.cmpi eq, %16, %17 : vector<8x384xi32>
    %cst = arith.constant 1.000000e+00 : f32
    %cst_3 = arith.constant 0.000000e+00 : f32
    %19 = vector.broadcast %cst : f32 to vector<8x384xf32>
    %20 = vector.broadcast %cst_3 : f32 to vector<8x384xf32>
    %21 = arith.select %18, %19, %20 : vector<8x384xi1>, vector<8x384xf32>
    %c0 = arith.constant 0 : index
    %c0_4 = arith.constant 0 : index
    %22 = vector.load %arg9[%c0, %c0_4] : memref<8x384xf32, #tpu.memory_space<vmem>>, vector<8x384xf32>
    tpu.vector_store %arg9[%c0, %c0_4], %21 {strides = array<i32>} : memref<8x384xf32, #tpu.memory_space<vmem>>, vector<8x384xf32>,
    %cst_5 = arith.constant 0.000000e+00 : f32
    %23 = vector.broadcast %cst_5 : f32 to vector<8x384xf32>
    %c0_6 = arith.constant 0 : index
    %c0_7 = arith.constant 0 : index
    %24 = vector.load %arg10[%c0_6, %c0_7] : memref<8x384xf32, #tpu.memory_space<vmem>>, vector<8x384xf32>
    tpu.vector_store %arg10[%c0_6, %c0_7], %23 {strides = array<i32>} : memref<8x384xf32, #tpu.memory_space<vmem>>, vector<8x384xf32>,
    %c0_8 = arith.constant 0 : index
    %25 = memref.load %arg1[%c0_8] : memref<2xi32, #tpu.memory_space<smem>>
    %c1 = arith.constant 1 : index
    %26 = memref.load %arg1[%c1] : memref<2xi32, #tpu.memory_space<smem>>
    %c0_9 = arith.constant 0 : index
    %c0_10 = arith.constant 0 : index
    %c0_11 = arith.constant 0 : index
    %27 = vector.load %arg2[%c0_9, %c0_10, %c0_11] : memref<8x4x32xf32, #tpu.memory_space<vmem>>, vector<8x4x32xf32>
    %cst_12 = arith.constant 0.000000e+00 : f32
    %28 = vector.broadcast %cst_12 : f32 to vector<8x32xf32>
    %cst_13 = arith.constant 0.000000e+00 : f32
    %29 = vector.broadcast %cst_13 : f32 to vector<8x32xf32>
    %c0_i32_14 = arith.constant 0 : i32
    %30 = arith.cmpi eq, %25, %c0_i32_14 : i32
    %31 = arith.extui %30 : i1 to i32
    %32 = arith.sitofp %31 : i32 to f32
    %c0_i32_15 = arith.constant 0 : i32
    %33 = arith.cmpi eq, %26, %c0_i32_15 : i32
    %34 = arith.extui %33 : i1 to i32
    %35 = arith.sitofp %34 : i32 to f32
    %36 = vector.extract_strided_slice %27 {offsets = [0, 0, 0], sizes = [8, 1, 32], strides = [1, 1, 1]} : vector<8x4x32xf32> to vector<8x1x32xf32>
    %37 = vector.shape_cast %36 : vector<8x1x32xf32> to vector<8x32xf32>
    %38 = vector.broadcast %32 : f32 to vector<8x32xf32>
    %39 = arith.mulf %37, %38 : vector<8x32xf32>
    %40 = arith.addf %28, %39 : vector<8x32xf32>
    %41 = vector.broadcast %35 : f32 to vector<8x32xf32>
    %42 = arith.mulf %37, %41 : vector<8x32xf32>
    %43 = arith.addf %29, %42 : vector<8x32xf32>
    %c1_i32_16 = arith.constant 1 : i32
    %44 = arith.cmpi eq, %25, %c1_i32_16 : i32
    %45 = arith.extui %44 : i1 to i32
    %46 = arith.sitofp %45 : i32 to f32
    %c1_i32_17 = arith.constant 1 : i32
    %47 = arith.cmpi eq, %26, %c1_i32_17 : i32
    %48 = arith.extui %47 : i1 to i32
    %49 = arith.sitofp %48 : i32 to f32
    %50 = vector.extract_strided_slice %27 {offsets = [0, 1, 0], sizes = [8, 1, 32], strides = [1, 1, 1]} : vector<8x4x32xf32> to vector<8x1x32xf32>
    %51 = vector.shape_cast %50 : vector<8x1x32xf32> to vector<8x32xf32>
    %52 = vector.broadcast %46 : f32 to vector<8x32xf32>
    %53 = arith.mulf %51, %52 : vector<8x32xf32>
    %54 = arith.addf %40, %53 : vector<8x32xf32>
    %55 = vector.broadcast %49 : f32 to vector<8x32xf32>
    %56 = arith.mulf %51, %55 : vector<8x32xf32>
    %57 = arith.addf %43, %56 : vector<8x32xf32>
    %c2_i32 = arith.constant 2 : i32
    %58 = arith.cmpi eq, %25, %c2_i32 : i32
    %59 = arith.extui %58 : i1 to i32
    %60 = arith.sitofp %59 : i32 to f32
    %c2_i32_18 = arith.constant 2 : i32
    %61 = arith.cmpi eq, %26, %c2_i32_18 : i32
    %62 = arith.extui %61 : i1 to i32
    %63 = arith.sitofp %62 : i32 to f32
    %64 = vector.extract_strided_slice %27 {offsets = [0, 2, 0], sizes = [8, 1, 32], strides = [1, 1, 1]} : vector<8x4x32xf32> to vector<8x1x32xf32>
    %65 = vector.shape_cast %64 : vector<8x1x32xf32> to vector<8x32xf32>
    %66 = vector.broadcast %60 : f32 to vector<8x32xf32>
    %67 = arith.mulf %65, %66 : vector<8x32xf32>
    %68 = arith.addf %54, %67 : vector<8x32xf32>
    %69 = vector.broadcast %63 : f32 to vector<8x32xf32>
    %70 = arith.mulf %65, %69 : vector<8x32xf32>
    %71 = arith.addf %57, %70 : vector<8x32xf32>
    %c3_i32 = arith.constant 3 : i32
    %72 = arith.cmpi eq, %25, %c3_i32 : i32
    %73 = arith.extui %72 : i1 to i32
    %74 = arith.sitofp %73 : i32 to f32
    %c3_i32_19 = arith.constant 3 : i32
    %75 = arith.cmpi eq, %26, %c3_i32_19 : i32
    %76 = arith.extui %75 : i1 to i32
    %77 = arith.sitofp %76 : i32 to f32
    %78 = vector.extract_strided_slice %27 {offsets = [0, 3, 0], sizes = [8, 1, 32], strides = [1, 1, 1]} : vector<8x4x32xf32> to vector<8x1x32xf32>
    %79 = vector.shape_cast %78 : vector<8x1x32xf32> to vector<8x32xf32>
    %80 = vector.broadcast %74 : f32 to vector<8x32xf32>
    %81 = arith.mulf %79, %80 : vector<8x32xf32>
    %82 = arith.addf %68, %81 : vector<8x32xf32>
    %83 = vector.broadcast %77 : f32 to vector<8x32xf32>
    %84 = arith.mulf %79, %83 : vector<8x32xf32>
    %85 = arith.addf %71, %84 : vector<8x32xf32>
    %c0_20 = arith.constant 0 : index
    %c0_21 = arith.constant 0 : index
    %86 = vector.load %arg9[%c0_20, %c0_21] : memref<8x384xf32, #tpu.memory_space<vmem>>, vector<8x32xf32>
    tpu.vector_store %arg9[%c0_20, %c0_21], %82 {strides = array<i32>} : memref<8x384xf32, #tpu.memory_space<vmem>>, vector<8x32xf32>,
    %c0_22 = arith.constant 0 : index
    %c0_23 = arith.constant 0 : index
    %87 = vector.load %arg10[%c0_22, %c0_23] : memref<8x384xf32, #tpu.memory_space<vmem>>, vector<8x32xf32>
    tpu.vector_store %arg10[%c0_22, %c0_23], %85 {strides = array<i32>} : memref<8x384xf32, #tpu.memory_space<vmem>>, vector<8x32xf32>,
    %c0_24 = arith.constant 0 : index
    %c0_25 = arith.constant 0 : index
    %c0_26 = arith.constant 0 : index
    %88 = vector.load %arg3[%c0_24, %c0_25, %c0_26] : memref<8x4x16xf32, #tpu.memory_space<vmem>>, vector<8x4x16xf32>
    %cst_27 = arith.constant 0.000000e+00 : f32
    %89 = vector.broadcast %cst_27 : f32 to vector<8x16xf32>
    %cst_28 = arith.constant 0.000000e+00 : f32
    %90 = vector.broadcast %cst_28 : f32 to vector<8x16xf32>
    %c0_i32_29 = arith.constant 0 : i32
    %91 = arith.cmpi eq, %25, %c0_i32_29 : i32
    %92 = arith.extui %91 : i1 to i32
    %93 = arith.sitofp %92 : i32 to f32
    %c0_i32_30 = arith.constant 0 : i32
    %94 = arith.cmpi eq, %26, %c0_i32_30 : i32
    %95 = arith.extui %94 : i1 to i32
    %96 = arith.sitofp %95 : i32 to f32
    %97 = vector.extract_strided_slice %88 {offsets = [0, 0, 0], sizes = [8, 1, 16], strides = [1, 1, 1]} : vector<8x4x16xf32> to vector<8x1x16xf32>
    %98 = vector.shape_cast %97 : vector<8x1x16xf32> to vector<8x16xf32>
    %99 = vector.broadcast %93 : f32 to vector<8x16xf32>
    %100 = arith.mulf %98, %99 : vector<8x16xf32>
    %101 = arith.addf %89, %100 : vector<8x16xf32>
    %102 = vector.broadcast %96 : f32 to vector<8x16xf32>
    %103 = arith.mulf %98, %102 : vector<8x16xf32>
    %104 = arith.addf %90, %103 : vector<8x16xf32>
    %c1_i32_31 = arith.constant 1 : i32
    %105 = arith.cmpi eq, %25, %c1_i32_31 : i32
    %106 = arith.extui %105 : i1 to i32
    %107 = arith.sitofp %106 : i32 to f32
    %c1_i32_32 = arith.constant 1 : i32
    %108 = arith.cmpi eq, %26, %c1_i32_32 : i32
    %109 = arith.extui %108 : i1 to i32
    %110 = arith.sitofp %109 : i32 to f32
    %111 = vector.extract_strided_slice %88 {offsets = [0, 1, 0], sizes = [8, 1, 16], strides = [1, 1, 1]} : vector<8x4x16xf32> to vector<8x1x16xf32>
    %112 = vector.shape_cast %111 : vector<8x1x16xf32> to vector<8x16xf32>
    %113 = vector.broadcast %107 : f32 to vector<8x16xf32>
    %114 = arith.mulf %112, %113 : vector<8x16xf32>
    %115 = arith.addf %101, %114 : vector<8x16xf32>
    %116 = vector.broadcast %110 : f32 to vector<8x16xf32>
    %117 = arith.mulf %112, %116 : vector<8x16xf32>
    %118 = arith.addf %104, %117 : vector<8x16xf32>
    %c2_i32_33 = arith.constant 2 : i32
    %119 = arith.cmpi eq, %25, %c2_i32_33 : i32
    %120 = arith.extui %119 : i1 to i32
    %121 = arith.sitofp %120 : i32 to f32
    %c2_i32_34 = arith.constant 2 : i32
    %122 = arith.cmpi eq, %26, %c2_i32_34 : i32
    %123 = arith.extui %122 : i1 to i32
    %124 = arith.sitofp %123 : i32 to f32
    %125 = vector.extract_strided_slice %88 {offsets = [0, 2, 0], sizes = [8, 1, 16], strides = [1, 1, 1]} : vector<8x4x16xf32> to vector<8x1x16xf32>
    %126 = vector.shape_cast %125 : vector<8x1x16xf32> to vector<8x16xf32>
    %127 = vector.broadcast %121 : f32 to vector<8x16xf32>
    %128 = arith.mulf %126, %127 : vector<8x16xf32>
    %129 = arith.addf %115, %128 : vector<8x16xf32>
    %130 = vector.broadcast %124 : f32 to vector<8x16xf32>
    %131 = arith.mulf %126, %130 : vector<8x16xf32>
    %132 = arith.addf %118, %131 : vector<8x16xf32>
    %c3_i32_35 = arith.constant 3 : i32
    %133 = arith.cmpi eq, %25, %c3_i32_35 : i32
    %134 = arith.extui %133 : i1 to i32
    %135 = arith.sitofp %134 : i32 to f32
    %c3_i32_36 = arith.constant 3 : i32
    %136 = arith.cmpi eq, %26, %c3_i32_36 : i32
    %137 = arith.extui %136 : i1 to i32
    %138 = arith.sitofp %137 : i32 to f32
    %139 = vector.extract_strided_slice %88 {offsets = [0, 3, 0], sizes = [8, 1, 16], strides = [1, 1, 1]} : vector<8x4x16xf32> to vector<8x1x16xf32>
    %140 = vector.shape_cast %139 : vector<8x1x16xf32> to vector<8x16xf32>
    %141 = vector.broadcast %135 : f32 to vector<8x16xf32>
    %142 = arith.mulf %140, %141 : vector<8x16xf32>
    %143 = arith.addf %129, %142 : vector<8x16xf32>
    %144 = vector.broadcast %138 : f32 to vector<8x16xf32>
    %145 = arith.mulf %140, %144 : vector<8x16xf32>
    %146 = arith.addf %132, %145 : vector<8x16xf32>
    %c0_37 = arith.constant 0 : index
    %c128 = arith.constant 128 : index
    %147 = vector.load %arg9[%c0_37, %c128] : memref<8x384xf32, #tpu.memory_space<vmem>>, vector<8x16xf32>
    tpu.vector_store %arg9[%c0_37, %c128], %143 {strides = array<i32>} : memref<8x384xf32, #tpu.memory_space<vmem>>, vector<8x16xf32>,
    %c0_38 = arith.constant 0 : index
    %c128_39 = arith.constant 128 : index
    %148 = vector.load %arg10[%c0_38, %c128_39] : memref<8x384xf32, #tpu.memory_space<vmem>>, vector<8x16xf32>
    tpu.vector_store %arg10[%c0_38, %c128_39], %146 {strides = array<i32>} : memref<8x384xf32, #tpu.memory_space<vmem>>, vector<8x16xf32>,
    %c0_40 = arith.constant 0 : index
    %c0_41 = arith.constant 0 : index
    %c0_42 = arith.constant 0 : index
    %149 = vector.load %arg4[%c0_40, %c0_41, %c0_42] : memref<8x4x32xf32, #tpu.memory_space<vmem>>, vector<8x4x32xf32>
    %cst_43 = arith.constant 0.000000e+00 : f32
    %150 = vector.broadcast %cst_43 : f32 to vector<8x32xf32>
    %cst_44 = arith.constant 0.000000e+00 : f32
    %151 = vector.broadcast %cst_44 : f32 to vector<8x32xf32>
    %c0_i32_45 = arith.constant 0 : i32
    %152 = arith.cmpi eq, %25, %c0_i32_45 : i32
    %153 = arith.extui %152 : i1 to i32
    %154 = arith.sitofp %153 : i32 to f32
    %c0_i32_46 = arith.constant 0 : i32
    %155 = arith.cmpi eq, %26, %c0_i32_46 : i32
    %156 = arith.extui %155 : i1 to i32
    %157 = arith.sitofp %156 : i32 to f32
    %158 = vector.extract_strided_slice %149 {offsets = [0, 0, 0], sizes = [8, 1, 32], strides = [1, 1, 1]} : vector<8x4x32xf32> to vector<8x1x32xf32>
    %159 = vector.shape_cast %158 : vector<8x1x32xf32> to vector<8x32xf32>
    %160 = vector.broadcast %154 : f32 to vector<8x32xf32>
    %161 = arith.mulf %159, %160 : vector<8x32xf32>
    %162 = arith.addf %150, %161 : vector<8x32xf32>
    %163 = vector.broadcast %157 : f32 to vector<8x32xf32>
    %164 = arith.mulf %159, %163 : vector<8x32xf32>
    %165 = arith.addf %151, %164 : vector<8x32xf32>
    %c1_i32_47 = arith.constant 1 : i32
    %166 = arith.cmpi eq, %25, %c1_i32_47 : i32
    %167 = arith.extui %166 : i1 to i32
    %168 = arith.sitofp %167 : i32 to f32
    %c1_i32_48 = arith.constant 1 : i32
    %169 = arith.cmpi eq, %26, %c1_i32_48 : i32
    %170 = arith.extui %169 : i1 to i32
    %171 = arith.sitofp %170 : i32 to f32
    %172 = vector.extract_strided_slice %149 {offsets = [0, 1, 0], sizes = [8, 1, 32], strides = [1, 1, 1]} : vector<8x4x32xf32> to vector<8x1x32xf32>
    %173 = vector.shape_cast %172 : vector<8x1x32xf32> to vector<8x32xf32>
    %174 = vector.broadcast %168 : f32 to vector<8x32xf32>
    %175 = arith.mulf %173, %174 : vector<8x32xf32>
    %176 = arith.addf %162, %175 : vector<8x32xf32>
    %177 = vector.broadcast %171 : f32 to vector<8x32xf32>
    %178 = arith.mulf %173, %177 : vector<8x32xf32>
    %179 = arith.addf %165, %178 : vector<8x32xf32>
    %c2_i32_49 = arith.constant 2 : i32
    %180 = arith.cmpi eq, %25, %c2_i32_49 : i32
    %181 = arith.extui %180 : i1 to i32
    %182 = arith.sitofp %181 : i32 to f32
    %c2_i32_50 = arith.constant 2 : i32
    %183 = arith.cmpi eq, %26, %c2_i32_50 : i32
    %184 = arith.extui %183 : i1 to i32
    %185 = arith.sitofp %184 : i32 to f32
    %186 = vector.extract_strided_slice %149 {offsets = [0, 2, 0], sizes = [8, 1, 32], strides = [1, 1, 1]} : vector<8x4x32xf32> to vector<8x1x32xf32>
    %187 = vector.shape_cast %186 : vector<8x1x32xf32> to vector<8x32xf32>
    %188 = vector.broadcast %182 : f32 to vector<8x32xf32>
    %189 = arith.mulf %187, %188 : vector<8x32xf32>
    %190 = arith.addf %176, %189 : vector<8x32xf32>
    %191 = vector.broadcast %185 : f32 to vector<8x32xf32>
    %192 = arith.mulf %187, %191 : vector<8x32xf32>
    %193 = arith.addf %179, %192 : vector<8x32xf32>
    %c3_i32_51 = arith.constant 3 : i32
    %194 = arith.cmpi eq, %25, %c3_i32_51 : i32
    %195 = arith.extui %194 : i1 to i32
    %196 = arith.sitofp %195 : i32 to f32
    %c3_i32_52 = arith.constant 3 : i32
    %197 = arith.cmpi eq, %26, %c3_i32_52 : i32
    %198 = arith.extui %197 : i1 to i32
    %199 = arith.sitofp %198 : i32 to f32
    %200 = vector.extract_strided_slice %149 {offsets = [0, 3, 0], sizes = [8, 1, 32], strides = [1, 1, 1]} : vector<8x4x32xf32> to vector<8x1x32xf32>
    %201 = vector.shape_cast %200 : vector<8x1x32xf32> to vector<8x32xf32>
    %202 = vector.broadcast %196 : f32 to vector<8x32xf32>
    %203 = arith.mulf %201, %202 : vector<8x32xf32>
    %204 = arith.addf %190, %203 : vector<8x32xf32>
    %205 = vector.broadcast %199 : f32 to vector<8x32xf32>
    %206 = arith.mulf %201, %205 : vector<8x32xf32>
    %207 = arith.addf %193, %206 : vector<8x32xf32>
    %c0_53 = arith.constant 0 : index
    %c256 = arith.constant 256 : index
    %208 = vector.load %arg9[%c0_53, %c256] : memref<8x384xf32, #tpu.memory_space<vmem>>, vector<8x32xf32>
    tpu.vector_store %arg9[%c0_53, %c256], %204 {strides = array<i32>} : memref<8x384xf32, #tpu.memory_space<vmem>>, vector<8x32xf32>,
    %c0_54 = arith.constant 0 : index
    %c256_55 = arith.constant 256 : index
    %209 = vector.load %arg10[%c0_54, %c256_55] : memref<8x384xf32, #tpu.memory_space<vmem>>, vector<8x32xf32>
    tpu.vector_store %arg10[%c0_54, %c256_55], %207 {strides = array<i32>} : memref<8x384xf32, #tpu.memory_space<vmem>>, vector<8x32xf32>,
    %c0_56 = arith.constant 0 : index
    %c0_57 = arith.constant 0 : index
    %c0_58 = arith.constant 0 : index
    %210 = vector.load %arg5[%c0_56, %c0_57, %c0_58] : memref<3x8x8xf32, #tpu.memory_space<vmem>>, vector<1x8x8xf32>
    %211 = vector.shape_cast %210 : vector<1x8x8xf32> to vector<8x8xf32>
    %c0_59 = arith.constant 0 : index
    %c0_60 = arith.constant 0 : index
    %212 = vector.load %arg10[%c0_59, %c0_60] : memref<8x384xf32, #tpu.memory_space<vmem>>, vector<8x128xf32>
    %cst_61 = arith.constant dense<0.000000e+00> : vector<8x128xf32>
    %213 = tpu.matmul %211, %212, %cst_61 {dimension_numbers = #tpu.dot_dimension_numbers<[1], [0], [0], [1], [0, 0, 1, 1], [], []>} : vector<8x8xf32>, vector<8x128xf32>, vector<8x128xf32> -> vector<8x128xf32>
    %c0_62 = arith.constant 0 : index
    %c0_63 = arith.constant 0 : index
    %214 = vector.load %arg11[%c0_62, %c0_63] : memref<8x384xf32, #tpu.memory_space<vmem>>, vector<8x128xf32>
    tpu.vector_store %arg11[%c0_62, %c0_63], %213 {strides = array<i32>} : memref<8x384xf32, #tpu.memory_space<vmem>>, vector<8x128xf32>,
    %c1_64 = arith.constant 1 : index
    %c0_65 = arith.constant 0 : index
    %c0_66 = arith.constant 0 : index
    %215 = vector.load %arg5[%c1_64, %c0_65, %c0_66] : memref<3x8x8xf32, #tpu.memory_space<vmem>>, vector<1x8x8xf32>
    %216 = vector.shape_cast %215 : vector<1x8x8xf32> to vector<8x8xf32>
    %c0_67 = arith.constant 0 : index
    %c128_68 = arith.constant 128 : index
    %217 = vector.load %arg10[%c0_67, %c128_68] : memref<8x384xf32, #tpu.memory_space<vmem>>, vector<8x128xf32>
    %cst_69 = arith.constant dense<0.000000e+00> : vector<8x128xf32>
    %218 = tpu.matmul %216, %217, %cst_69 {dimension_numbers = #tpu.dot_dimension_numbers<[1], [0], [0], [1], [0, 0, 1, 1], [], []>} : vector<8x8xf32>, vector<8x128xf32>, vector<8x128xf32> -> vector<8x128xf32>
    %c0_70 = arith.constant 0 : index
    %c128_71 = arith.constant 128 : index
    %219 = vector.load %arg11[%c0_70, %c128_71] : memref<8x384xf32, #tpu.memory_space<vmem>>, vector<8x128xf32>
    tpu.vector_store %arg11[%c0_70, %c128_71], %218 {strides = array<i32>} : memref<8x384xf32, #tpu.memory_space<vmem>>, vector<8x128xf32>,
    %c2 = arith.constant 2 : index
    %c0_72 = arith.constant 0 : index
    %c0_73 = arith.constant 0 : index
    %220 = vector.load %arg5[%c2, %c0_72, %c0_73] : memref<3x8x8xf32, #tpu.memory_space<vmem>>, vector<1x8x8xf32>
    %221 = vector.shape_cast %220 : vector<1x8x8xf32> to vector<8x8xf32>
    %c0_74 = arith.constant 0 : index
    %c256_75 = arith.constant 256 : index
    %222 = vector.load %arg10[%c0_74, %c256_75] : memref<8x384xf32, #tpu.memory_space<vmem>>, vector<8x128xf32>
    %cst_76 = arith.constant dense<0.000000e+00> : vector<8x128xf32>
    %223 = tpu.matmul %221, %222, %cst_76 {dimension_numbers = #tpu.dot_dimension_numbers<[1], [0], [0], [1], [0, 0, 1, 1], [], []>} : vector<8x8xf32>, vector<8x128xf32>, vector<8x128xf32> -> vector<8x128xf32>
    %c0_77 = arith.constant 0 : index
    %c256_78 = arith.constant 256 : index
    %224 = vector.load %arg11[%c0_77, %c256_78] : memref<8x384xf32, #tpu.memory_space<vmem>>, vector<8x128xf32>
    tpu.vector_store %arg11[%c0_77, %c256_78], %223 {strides = array<i32>} : memref<8x384xf32, #tpu.memory_space<vmem>>, vector<8x128xf32>,
    %c0_79 = arith.constant 0 : index
    %c0_80 = arith.constant 0 : index
    %225 = vector.load %arg9[%c0_79, %c0_80] : memref<8x384xf32, #tpu.memory_space<vmem>>, vector<8x384xf32>
    %226 = arith.truncf %225 : vector<8x384xf32> to vector<8x384xbf16>
    %c0_81 = arith.constant 0 : index
    %c0_82 = arith.constant 0 : index
    %227 = vector.load %arg6[%c0_81, %c0_82] : memref<384x384xbf16, #tpu.memory_space<vmem>>, vector<384x384xbf16>
    %cst_83 = arith.constant dense<0.000000e+00> : vector<8x384xf32>
    %228 = tpu.matmul %226, %227, %cst_83 {dimension_numbers = #tpu.dot_dimension_numbers<[1], [0], [0], [1], [0, 0, 1, 1], [], []>} : vector<8x384xbf16>, vector<384x384xbf16>, vector<8x384xf32> -> vector<8x384xf32>
    %cst_84 = arith.constant 0.000000e+00 : f32
    %229 = vector.broadcast %cst_84 : f32 to vector<8x384xf32>
    %230 = arith.maximumf %228, %229 : vector<8x384xf32>
    %231 = arith.truncf %230 : vector<8x384xf32> to vector<8x384xbf16>
    %c0_85 = arith.constant 0 : index
    %c0_86 = arith.constant 0 : index
    %232 = vector.load %arg7[%c0_85, %c0_86] : memref<384x768xbf16, #tpu.memory_space<vmem>>, vector<384x768xbf16>
    %cst_87 = arith.constant dense<0.000000e+00> : vector<8x768xf32>
    %233 = tpu.matmul %231, %232, %cst_87 {dimension_numbers = #tpu.dot_dimension_numbers<[1], [0], [0], [1], [0, 0, 1, 1], [], []>} : vector<8x384xbf16>, vector<384x768xbf16>, vector<8x768xf32> -> vector<8x768xf32>
    %234 = vector.extract_strided_slice %233 {offsets = [0, 0], sizes = [8, 384], strides = [1, 1]} : vector<8x768xf32> to vector<8x384xf32>
    %235 = vector.extract_strided_slice %233 {offsets = [0, 384], sizes = [8, 384], strides = [1, 1]} : vector<8x768xf32> to vector<8x384xf32>
    %236 = math.tanh %235 : vector<8x384xf32>
    %c0_88 = arith.constant 0 : index
    %c0_89 = arith.constant 0 : index
    %237 = vector.load %arg10[%c0_88, %c0_89] : memref<8x384xf32, #tpu.memory_space<vmem>>, vector<8x384xf32>
    %c0_90 = arith.constant 0 : index
    %c0_91 = arith.constant 0 : index
    %238 = vector.load %arg11[%c0_90, %c0_91] : memref<8x384xf32, #tpu.memory_space<vmem>>, vector<8x384xf32>
    %239 = arith.subf %234, %238 : vector<8x384xf32>
    %240 = arith.mulf %239, %239 : vector<8x384xf32>
    %241 = arith.subf %234, %237 : vector<8x384xf32>
    %242 = arith.mulf %241, %241 : vector<8x384xf32>
    %243 = arith.subf %240, %242 : vector<8x384xf32>
    %cst_92 = arith.constant 0.000000e+00 : f32
    %244 = vector.broadcast %cst_92 : f32 to vector<8x384xf32>
    %245 = arith.subf %244, %236 : vector<8x384xf32>
    %246 = math.exp %245 : vector<8x384xf32>
    %247 = arith.mulf %243, %246 : vector<8x384xf32>
    %248 = vector.shape_cast %247 : vector<8x384xf32> to vector<1x8x384xf32>
    %cst_93 = arith.constant dense<0.000000e+00> : vector<1xf32>
    %249 = vector.multi_reduction <add>, %248, %cst_93 [1, 2] : vector<1x8x384xf32> to vector<1xf32>
    %250 = vector.shape_cast %249 : vector<1xf32> to vector<1x1x1xf32>
    %251 = vector.extract %250[0, 0, 0] : f32 from vector<1x1x1xf32>
    %cst_94 = arith.constant 4.800000e+01 : f32
    %252 = arith.divf %251, %cst_94 : f32
    %c0_95 = arith.constant 0 : index
    %c0_96 = arith.constant 0 : index
    %253 = memref.load %arg8[%c0_95, %c0_96] : memref<1x1xf32, #tpu.memory_space<smem>>
    memref.store %252, %arg8[%c0_95, %c0_96] : memref<1x1xf32, #tpu.memory_space<smem>>
    return
  }
  func.func @transform_0(%arg0: i32, %arg1: memref<2xi32, #tpu.memory_space<smem>>) -> (i32, i32, i32) {
    %c0_i32 = arith.constant 0 : i32
    %c0_i32_0 = arith.constant 0 : i32
    %c0_i32_1 = arith.constant 0 : i32
    %c0_i32_2 = arith.constant 0 : i32
    return %c0_i32, %c0_i32_0, %c0_i32_1 : i32, i32, i32
  }
  func.func @transform_1(%arg0: i32, %arg1: memref<2xi32, #tpu.memory_space<smem>>) -> (i32, i32, i32) {
    %c0_i32 = arith.constant 0 : i32
    %c0_i32_0 = arith.constant 0 : i32
    %c0_i32_1 = arith.constant 0 : i32
    %c0_i32_2 = arith.constant 0 : i32
    return %c0_i32, %c0_i32_0, %c0_i32_1 : i32, i32, i32
  }
  func.func @transform_2(%arg0: i32, %arg1: memref<2xi32, #tpu.memory_space<smem>>) -> (i32, i32, i32) {
    %c0_i32 = arith.constant 0 : i32
    %c0_i32_0 = arith.constant 0 : i32
    %c0_i32_1 = arith.constant 0 : i32
    %c0_i32_2 = arith.constant 0 : i32
    return %c0_i32, %c0_i32_0, %c0_i32_1 : i32, i32, i32
  }
  func.func @transform_3(%arg0: i32, %arg1: memref<2xi32, #tpu.memory_space<smem>>) -> (i32, i32, i32) {
    %c0_i32 = arith.constant 0 : i32
    %c0_i32_0 = arith.constant 0 : i32
    %c0_i32_1 = arith.constant 0 : i32
    %c0_i32_2 = arith.constant 0 : i32
    return %c0_i32, %c0_i32_0, %c0_i32_1 : i32, i32, i32
  }
  func.func @transform_4(%arg0: i32, %arg1: memref<2xi32, #tpu.memory_space<smem>>) -> (i32, i32) {
    %c0_i32 = arith.constant 0 : i32
    %c0_i32_0 = arith.constant 0 : i32
    %c0_i32_1 = arith.constant 0 : i32
    return %c0_i32, %c0_i32_0 : i32, i32
  }
  func.func @transform_5(%arg0: i32, %arg1: memref<2xi32, #tpu.memory_space<smem>>) -> (i32, i32) {
    %c0_i32 = arith.constant 0 : i32
    %c0_i32_0 = arith.constant 0 : i32
    %c0_i32_1 = arith.constant 0 : i32
    return %c0_i32, %c0_i32_0 : i32, i32
  }
  func.func @transform_6(%arg0: i32, %arg1: memref<2xi32, #tpu.memory_space<smem>>) -> (i32, i32) {
    %c0_i32 = arith.constant 0 : i32
    %c0_i32_0 = arith.constant 0 : i32
    %c0_i32_1 = arith.constant 0 : i32
    return %c0_i32, %c0_i32_0 : i32, i32
  }
}

</mosaic_0001>

<bundles_post_ra>
// kernel: exid_forward.11
= control target key start
LH: loop header
LB: loop body
LE: loop exit
PB: predicated region body
PF: predicated region fallthrough
CT: control target
= control target key end

     0   :  { %s4740_s0 = inlined_call_operand.vmem [shape: s32[2], index: 0, kind: input, shape index: {}]   ;;  %s4741_s1 = inlined_call_operand.vmem [shape: f32[8,4,32], index: 1, kind: input, shape index: {}]   ;;  %s4742_s2 = inlined_call_operand.vmem [shape: f32[8,4,16], index: 2, kind: input, shape index: {}]   ;;  %s4743_s3 = inlined_call_operand.vmem [shape: f32[8,4,32], index: 3, kind: input, shape index: {}]   ;;  %s4744_s4 = inlined_call_operand.vmem [shape: f32[3,8,8], index: 4, kind: input, shape index: {}]   ;;  %s4745_s5 = inlined_call_operand.hbm [shape: bf16[384,384], index: 5, kind: input, shape index: {}]   ;;  %s4746_s6 = inlined_call_operand.hbm [shape: bf16[384,768], index: 6, kind: input, shape index: {}]   ;;  %s4747_s7 = inlined_call_operand.hbm [shape: f32[1,1], index: 7, kind: output, shape index: {}]  }
   0x1   :  { %s12_s26 = sshll.u32 %s4740_s0, 4  ;;  %s13_s26 = int_to_ptr.vmem [resolvable:$true] %s12_s26 }
   0x2   :  { %s3848_s27 = scalar_lea.vmem %s13_s26, 16  ;;  %p3853_p1 = scmp.lt.s32.totalorder %s13_s26, %s13_s26 }
   0x3   :  { %p3849_p0 = scmp.ne.s32.totalorder %s13_s26, %s3848_s27  ;;  %p3854_p2 = scmp.lt.s32.totalorder %s3848_s27, %s3848_s27 }
   0x5   :  { %p3855_p3 = por %p3854_p2, %p3853_p1 }
   0x7   :  { %p3856_p4 = pnand %p3855_p3, %p3849_p0 }
   0x9   :  { %3859 = shalt.err (!%p3856_p4)  }
   0xa   :  { %s3916_s28 = smov [#allocation6]  }
   0xb   :  { %15 = dma.vmem_to_smem %s13_s26, 16, %s3916_s28, [#allocation5] }
   0xc   :  { %3908 = dma.done.wait [#allocation5], 16 }
   0xd   :  { %3909 = vsyncadd [#allocation5], 4294967280 }
   0xe   :  { %17 = sfence }
   0xf   :  { %18 = vsyncpa [#allocation8], 0 }
  0x10   :  { %19 = vsyncpa [#allocation11], 0 }
  0x11   :  { %20 = vsyncpa [#allocation9], 0  ;;  %s3917_s29 = smov [#allocation7]  }
  0x12   :  { %s34_s30 = sshll.u32 %s3917_s29, 4  ;;  %s35_s30 = int_to_ptr.vmem [resolvable:$true] %s34_s30 }
  0x13   :  { %s3868_s0 = scalar_lea.vmem %s35_s30, 9216  ;;  %p3873_p6 = scmp.lt.s32.totalorder %s35_s30, %s35_s30 }
  0x14   :  { %p3869_p5 = scmp.ne.s32.totalorder %s35_s30, %s3868_s0  ;;  %p3874_p7 = scmp.lt.s32.totalorder %s3868_s0, %s3868_s0 }
  0x16   :  { %p3875_p8 = por %p3874_p7, %p3873_p6 }
  0x18   :  { %p3876_p9 = pnand %p3875_p8, %p3869_p5 }
  0x1a   :  { %3879 = shalt.err (!%p3876_p9)
}
  0x1b   :  { %s3918_s8 = smov 192   ;;  %s3919_s9 = smov 12  }
  0x1c   :  { %40 = dma.hbm_to_vmem [thread:$0]  %s4745_s5, 9216, %s35_s30, [#allocation8], %s3918_s8, %s3918_s8, %s3919_s9  }
  0x1d   :  { %s3920_s12 = smov [#allocation10]  }
  0x1e   :  { %s46_s13 = sshll.u32 %s3920_s12, 4  ;;  %s47_s13 = int_to_ptr.vmem [resolvable:$true] %s46_s13 }
  0x1f   :  { %s3888_s14 = scalar_lea.vmem %s47_s13, 18432  ;;  %p3893_p11 = scmp.lt.s32.totalorder %s47_s13, %s47_s13 }
  0x20   :  { %p3889_p10 = scmp.ne.s32.totalorder %s47_s13, %s3888_s14  ;;  %p3894_p12 = scmp.lt.s32.totalorder %s3888_s14, %s3888_s14 }
  0x22   :  { %p3895_p13 = por %p3894_p12, %p3893_p11 }
  0x24   :  { %p3896_p0 = pnand %p3895_p13, %p3889_p10 }
  0x26   :  { %3899 = shalt.err (!%p3896_p0)
}
  0x27   :  { %s3921_s15 = smov 384   ;;  %s3922_s16 = smov 24  }
  0x28   :  { %52 = dma.hbm_to_vmem [thread:$0]  %s4746_s6, 18432, %s47_s13, [#allocation11], %s3921_s15, %s3921_s15, %s3922_s16  }
  0x29   :  { %3910 = dma.done.wait [#allocation8], 9216  }
  0x2a   :  { %3911 = vsyncadd [#allocation8], 4294958080 }
  0x2b   :  { %3912 = dma.done.wait [#allocation11], 18432  }
  0x2c   :  { %3913 = vsyncadd [#allocation11], 4294948864  ;;  %v3923_v0 = vmov 0.0   ;;  %s3201_s5 = sld [smem:[#allocation6 + $0x1]]  ;;  %vm3924_vm0 = vmmov 0   ;;  %v60_v1 = vlaneseq  ;;  %vm435_vm1 = vcmask 1041409  }
  0x2d   :  { %3465 = vmatprep.subr.mxu1 %v3923_v0  ;;  %109 = vst [vmem:[#allocation3] sm:$0xff] %v3923_v0  ;;  %110 = vst [vmem:[#allocation3 + $0x8] sm:$0xff] %v3923_v0  ;;  %3460 = vmatprep.subr.mxu0 %v3923_v0  ;;  %v3990_v3 = vld [vmem:[%s4742_s2] sm:$0xf]  ;;  %v3995_v4 = vld [vmem:[%s4742_s2 + $0x4] sm:$0xf] }
  0x2e   :  { %111 = vst [vmem:[#allocation3 + $0x10] sm:$0xff] %v3923_v0  ;;  %3467 = vmatprep.mubr.msk.f32.mxu1 %vm3924_vm0, %v3923_v0  ;;  %3462 = vmatprep.mubr.msk.f32.mxu0 %vm3924_vm0, %v3923_v0  ;;  %v3985_v2 = vand.u32 127, %v60_v1  ;;  %v4000_v5 = vld [vmem:[%s4742_s2 + $0x8] sm:$0xf]  ;;  %v4005_v6 = vld [vmem:[%s4742_s2 + $0xc] sm:$0xf] }
  0x2f   :  { %v4010_v7 = vld [vmem:[%s4742_s2 + $0x10] sm:$0xf]  ;;  %v4015_v8 = vld [vmem:[%s4742_s2 + $0x14] sm:$0xf]  ;;  %v4032_v13 = vld [vmem:[%s4742_s2 + $0x18] sm:$0xf] }
  0x30   :  { %v4021_v10 = vadd.s32 256, %v3985_v2  ;;  %v4024_v11 = vadd.s32 128, %v3985_v2  ;;  %v4043_v17 = vld [vmem:[%s4742_s2 + $0x1c] sm:$0xf]  ;;  %vm438_vm2 = vcmask 1042434   ;;  %vm441_vm3 = vcmask 1043459  }
  0x31   :  { %vm444_vm4 = vcmask 1044484   ;;  %vm447_vm5 = vcmask 1045509   ;;  %vm450_vm6 = vcmask 1046534   ;;  %vm453_vm7 = vcmask 1047559   ;;  %s3926_s15 = smov [#allocation12]  }
  0x32   :  { %p125_p1 = scmp.eq.s32.totalorder %s3201_s5, 0  ;;  %p165_p2 = scmp.eq.s32.totalorder %s3201_s5, 1  ;;  %vm785_vm8 = vcmask 130048   ;;  %vm1141_vm9 = vcmask 64512   ;;  %vm456_vm10 = vcmask 261120   ;;  %vm100_vm13 = vcmp.eq.s32.totalorder %v3985_v2, 127 }
  0x33   :  { %p253_p3 = scmp.eq.s32.totalorder %s3201_s5, 2  ;;  %p341_p4 = scmp.eq.s32.totalorder %s3201_s5, 3 }
  0x34   :  { %s126_s6 = scalar_select %p125_p1, 1, 0 }
  0x35   :  { %s166_s19 = scalar_select %p165_p2, 1, 0 }
  0x36   :  { %s127_s20 = scvt.s32.f32 %s126_s6 }
  0x37   :  { %s167_s27 = scvt.s32.f32 %s166_s19 }
  0x38   :  { %v4017_v9 = vstv %s127_s20  ;;  %s254_s10 = scalar_select %p253_p3, 1, 0 }
  0x39   :  { %v4026_v12 = vstv %s167_s27  ;;  %s342_s11 = scalar_select %p341_p4, 1, 0  ;;  %v506_v14 = vmul.f32 %v3990_v3, %v4017_v9  ;;  %v507_v15 = vmul.f32 %v3995_v4, %v4017_v9  ;;  %v508_v16 = vmul.f32 %v4000_v5, %v4017_v9 }
  0x3a   :  { %s255_s14 = scvt.s32.f32 %s254_s10  ;;  %v509_v18 = vmul.f32 %v4005_v6, %v4017_v9  ;;  %v510_v19 = vmul.f32 %v4010_v7, %v4017_v9  ;;  %v511_v20 = vmul.f32 %v4015_v8, %v4017_v9  ;;  %v512_v21 = vmul.f32 %v4032_v13, %v4017_v9  ;;  %s4212_s10 = sld [smem:[#allocation6]] }
  0x3b   :  { %s343_s17 = scvt.s32.f32 %s342_s11  ;;  %v513_v22 = vmul.f32 %v4043_v17, %v4017_v9  ;;  %v562_v23 = vmul.f32 %v3990_v3, %v4026_v12  ;;  %v563_v24 = vmul.f32 %v3995_v4, %v4026_v12  ;;  %v564_v25 = vmul.f32 %v4000_v5, %v4026_v12 }
  0x3c   :  { %v4061_v26 = vstv %s255_s14  ;;  %v565_v27 = vmul.f32 %v4005_v6, %v4026_v12  ;;  %v566_v28 = vmul.f32 %v4010_v7, %v4026_v12  ;;  %v567_v29 = vmul.f32 %v4015_v8, %v4026_v12 }
  0x3d   :  { %v4069_v30 = vstv %s343_s17  ;;  %v568_v31 = vmul.f32 %v4032_v13, %v4026_v12  ;;  %v569_v32 = vmul.f32 %v4043_v17, %v4026_v12  ;;  %v578_v33 = vrot.slane %v562_v23, 1 }
  0x3e   :  { %v579_v34 = vrot.slane %v563_v24, 1  ;;  %v580_v35 = vrot.slane %v564_v25, 1  ;;  %v581_v36 = vrot.slane %v565_v27, 1  ;;  %v582_v37 = vrot.slane %v566_v28, 1 }
  0x3f   :  { %v583_v38 = vrot.slane %v567_v29, 1  ;;  %v584_v39 = vrot.slane %v568_v31, 1  ;;  %v585_v40 = vrot.slane %v569_v32, 1  ;;  %v594_v41 = vadd.f32 %v578_v33, %v506_v14 }
  0x40   :  { %v595_v42 = vadd.f32 %v579_v34, %v507_v15  ;;  %v596_v43 = vadd.f32 %v580_v35, %v508_v16  ;;  %v597_v44 = vadd.f32 %v581_v36, %v509_v18  ;;  %v598_v45 = vadd.f32 %v582_v37, %v510_v19  ;;  %p122_p5 = scmp.eq.s32.totalorder %s4212_s10, 0  ;;  %p162_p6 = scmp.eq.s32.totalorder %s4212_s10, 1 }
  0x41   :  { %v599_v46 = vadd.f32 %v583_v38, %v511_v20  ;;  %v600_v47 = vadd.f32 %v584_v39, %v512_v21  ;;  %v601_v48 = vadd.f32 %v585_v40, %v513_v22  ;;  %v642_v49 = vmul.f32 %v3990_v3, %v4061_v26  ;;  %p250_p7 = scmp.eq.s32.totalorder %s4212_s10, 2  ;;  %p338_p8 = scmp.eq.s32.totalorder %s4212_s10, 3 }
  0x42   :  { %v643_v50 = vmul.f32 %v3995_v4, %v4061_v26  ;;  %v644_v51 = vmul.f32 %v4000_v5, %v4061_v26  ;;  %v645_v52 = vmul.f32 %v4005_v6, %v4061_v26  ;;  %v646_v53 = vmul.f32 %v4010_v7, %v4061_v26  ;;  %s4331_s26 = scalar_select %p122_p5, 1, 0 }
  0x43   :  { %v647_v54 = vmul.f32 %v4015_v8, %v4061_v26  ;;  %v648_v55 = vmul.f32 %v4032_v13, %v4061_v26  ;;  %v649_v56 = vmul.f32 %v4043_v17, %v4061_v26  ;;  %v658_v57 = vrot.slane %v642_v49, 2  ;;  %s4335_s27 = scalar_select %p162_p6, 1, 0 }
  0x44   :  { %v659_v58 = vrot.slane %v643_v50, 2  ;;  %v660_v59 = vrot.slane %v644_v51, 2  ;;  %v661_v60 = vrot.slane %v645_v52, 2  ;;  %v662_v61 = vrot.slane %v646_v53, 2  ;;  %v4132_v53 = vld [vmem:[%s4741_s1 + $0x10] sm:$0xf]  ;;  %s124_s30 = scvt.s32.f32 %s4331_s26 }
  0x45   :  { %v663_v62 = vrot.slane %v647_v54, 2  ;;  %v664_v63 = vrot.slane %v648_v55, 2  ;;  %v665_v1 = vrot.slane %v649_v56, 2  ;;  %v674_v14 = vadd.f32 %v658_v57, %v594_v41  ;;  %v4140_v56 = vld [vmem:[%s4741_s1 + $0x14] sm:$0xf]  ;;  %s164_s0 = scvt.s32.f32 %s4335_s27 }
  0x46   :  { %v675_v15 = vadd.f32 %v659_v58, %v595_v42  ;;  %v676_v16 = vadd.f32 %v660_v59, %v596_v43  ;;  %v677_v18 = vadd.f32 %v661_v60, %v597_v44  ;;  %v678_v19 = vadd.f32 %v662_v61, %v598_v45  ;;  %v4120_v43 = vld [vmem:[%s4741_s1 + $0x8] sm:$0xf]  ;;  %v4125_v44 = vld [vmem:[%s4741_s1 + $0xc] sm:$0xf]  ;;  %v4145_v57 = vld [vmem:[%s4741_s1 + $0x18] sm:$0xf] }
  0x47   :  { %v679_v20 = vadd.f32 %v663_v62, %v599_v46  ;;  %v680_v21 = vadd.f32 %v664_v63, %v600_v47  ;;  %v681_v22 = vadd.f32 %v665_v1, %v601_v48  ;;  %v722_v23 = vmul.f32 %v3990_v3, %v4069_v30  ;;  %v4150_v58 = vld [vmem:[%s4741_s1 + $0x1c] sm:$0xf]  ;;  %s4353_s28 = scalar_select %p250_p7, 1, 0 }
  0x48   :  { %v723_v24 = vmul.f32 %v3995_v4, %v4069_v30  ;;  %v724_v25 = vmul.f32 %v4000_v5, %v4069_v30  ;;  %v725_v27 = vmul.f32 %v4005_v6, %v4069_v30  ;;  %v726_v28 = vmul.f32 %v4010_v7, %v4069_v30  ;;  %s4367_s29 = scalar_select %p338_p8, 1, 0 }
  0x49   :  { %v727_v29 = vmul.f32 %v4015_v8, %v4069_v30  ;;  %v728_v3 = vmul.f32 %v4032_v13, %v4069_v30  ;;  %v729_v31 = vmul.f32 %v4043_v17, %v4069_v30  ;;  %v738_v4 = vrot.slane %v722_v23, 3  ;;  %v4110_v13 = vld [vmem:[%s4741_s1] sm:$0xf]  ;;  %v4115_v17 = vld [vmem:[%s4741_s1 + $0x4] sm:$0xf]  ;;  %s252_s8 = scvt.s32.f32 %s4353_s28 }
  0x4a   :  { %v739_v32 = vrot.slane %v723_v24, 3  ;;  %v740_v5 = vrot.slane %v724_v25, 3  ;;  %v741_v33 = vrot.slane %v725_v27, 3  ;;  %v742_v34 = vrot.slane %v726_v28, 3  ;;  %s340_s9 = scvt.s32.f32 %s4367_s29 }
  0x4b   :  { %v743_v6 = vrot.slane %v727_v29, 3  ;;  %v744_v35 = vrot.slane %v728_v3, 3  ;;  %v745_v7 = vrot.slane %v729_v31, 3  ;;  %v754_v36 = vadd.f32 %v738_v4, %v674_v14 }
  0x4c   :  { %v755_v37 = vadd.f32 %v739_v32, %v675_v15  ;;  %v756_v38 = vadd.f32 %v740_v5, %v676_v16  ;;  %v757_v8 = vadd.f32 %v741_v33, %v677_v18  ;;  %v758_v39 = vadd.f32 %v742_v34, %v678_v19 }
  0x4d   :  { %v759_v40 = vadd.f32 %v743_v6, %v679_v20  ;;  %v760_v41 = vadd.f32 %v744_v35, %v680_v21  ;;  %v761_v42 = vadd.f32 %v745_v7, %v681_v22  ;;  %v146_v45 = vmul.f32 %v4017_v9, %v4110_v13 }
  0x4e   :  { %v795_v46 = vrot.slane %v755_v37, 7  ;;  %v797_v47 = vrot.slane %v756_v38, 6  ;;  %v799_v48 = vrot.slane %v757_v8, 5  ;;  %v801_v49 = vrot.slane %v758_v39, 4 }
  0x4f   :  { %v803_v50 = vrot.slane %v759_v40, 3  ;;  %v805_v51 = vrot.slane %v760_v41, 2  ;;  %v807_v52 = vrot.slane %v761_v42, 1  ;;  %v147_v54 = vmul.f32 %v4017_v9, %v4115_v17 }
  0x50   :  { %v796_v55 = vsel %vm435_vm1, %v795_v46, %v754_v36  ;;  %v148_v59 = vmul.f32 %v4017_v9, %v4120_v43  ;;  %v149_v60 = vmul.f32 %v4017_v9, %v4125_v44  ;;  %v150_v61 = vmul.f32 %v4017_v9, %v4132_v53 }
  0x51   :  { %v798_v62 = vsel %vm438_vm2, %v797_v47, %v796_v55  ;;  %v151_v63 = vmul.f32 %v4017_v9, %v4140_v56  ;;  %v152_v1 = vmul.f32 %v4017_v9, %v4145_v57  ;;  %v153_v14 = vmul.f32 %v4017_v9, %v4150_v58 }
  0x52   :  { %v800_v15 = vsel %vm441_vm3, %v799_v48, %v798_v62  ;;  %v210_v16 = vmul.f32 %v4026_v12, %v4110_v13  ;;  %v211_v18 = vmul.f32 %v4026_v12, %v4115_v17  ;;  %v212_v19 = vmul.f32 %v4026_v12, %v4120_v43 }
  0x53   :  { %v802_v20 = vsel %vm444_vm4, %v801_v49, %v800_v15  ;;  %v213_v21 = vmul.f32 %v4026_v12, %v4125_v44  ;;  %v214_v22 = vmul.f32 %v4026_v12, %v4132_v53  ;;  %v215_v23 = vmul.f32 %v4026_v12, %v4140_v56 }
  0x54   :  { %v804_v24 = vsel %vm447_vm5, %v803_v50, %v802_v20  ;;  %v216_v25 = vmul.f32 %v4026_v12, %v4145_v57  ;;  %v217_v27 = vmul.f32 %v4026_v12, %v4150_v58  ;;  %v226_v28 = vrot.slane %v210_v16, 1  ;;  %v3203_v50 = vld [vmem:[%s4744_s4 + $0x8] sm:$0xff]  ;;  %v3513_v20 = vld [vmem:[#allocation7 + $0x94] ss:$12 sps:$4 sm:$0xff]  }
  0x55   :  { %v806_v29 = vsel %vm450_vm6, %v805_v51, %v804_v24  ;;  %v227_v3 = vrot.slane %v211_v18, 1  ;;  %v228_v31 = vrot.slane %v212_v19, 1  ;;  %v229_v4 = vrot.slane %v213_v21, 1 }
  0x56   :  { %v808_v32 = vsel %vm453_vm7, %v807_v52, %v806_v29  ;;  %v230_v5 = vrot.slane %v214_v22, 1  ;;  %v231_v33 = vrot.slane %v215_v23, 1  ;;  %v232_v34 = vrot.slane %v216_v25, 1 }
  0x57   :  { %810 = vst.msk [vmem:[#allocation3 + $0x8] sm:$0xff] %vm785_vm8, %v808_v32  ;;  %v233_v6 = vrot.slane %v217_v27, 1  ;;  %v242_v35 = vadd.f32 %v226_v28, %v146_v45  ;;  %v243_v7 = vadd.f32 %v227_v3, %v147_v54  ;;  %v244_v36 = vadd.f32 %v228_v31, %v148_v59  ;;  %v3510_v59 = vld [vmem:[#allocation7 + $0xac] ss:$12 sps:$4 sm:$0xff]   ;;  %v3511_v3 = vld [vmem:[#allocation7 + $0x90] ss:$12 sps:$4 sm:$0xff]  }
  0x58   :  { %v245_v37 = vadd.f32 %v229_v4, %v149_v60  ;;  %v246_v38 = vadd.f32 %v230_v5, %v150_v61  ;;  %v247_v8 = vadd.f32 %v231_v33, %v151_v63  ;;  %v248_v39 = vadd.f32 %v232_v34, %v152_v1  ;;  %v3508_v1 = vld [vmem:[#allocation7 + $0xa8] ss:$12 sps:$4 sm:$0xff]  }
  0x59   :  { %v249_v40 = vadd.f32 %v233_v6, %v153_v14  ;;  %v298_v41 = vmul.f32 %v4061_v26, %v4110_v13  ;;  %v299_v42 = vmul.f32 %v4061_v26, %v4115_v17  ;;  %v300_v46 = vmul.f32 %v4061_v26, %v4120_v43  ;;  %v3516_v32 = vld [vmem:[#allocation7 + $0x7c] ss:$12 sps:$4 sm:$0xff]  }
  0x5a   :  { %v301_v47 = vmul.f32 %v4061_v26, %v4125_v44  ;;  %v302_v45 = vmul.f32 %v4061_v26, %v4132_v53  ;;  %v303_v48 = vmul.f32 %v4061_v26, %v4140_v56  ;;  %v304_v49 = vmul.f32 %v4061_v26, %v4145_v57 }
  0x5b   :  { %v305_v51 = vmul.f32 %v4061_v26, %v4150_v58  ;;  %v314_v52 = vrot.slane %v298_v41, 2  ;;  %v315_v54 = vrot.slane %v299_v42, 2  ;;  %v316_v55 = vrot.slane %v300_v46, 2  ;;  %v4234_v42 = vld [vmem:[%s4743_s3 + $0x4] sm:$0xf] }
  0x5c   :  { %v317_v60 = vrot.slane %v301_v47, 2  ;;  %v318_v61 = vrot.slane %v302_v45, 2  ;;  %v319_v62 = vrot.slane %v303_v48, 2  ;;  %v320_v63 = vrot.slane %v304_v49, 2  ;;  %v4239_v48 = vld [vmem:[%s4743_s3 + $0x8] sm:$0xf] }
  0x5d   :  { %v321_v14 = vrot.slane %v305_v51, 2  ;;  %v330_v15 = vadd.f32 %v314_v52, %v242_v35  ;;  %v331_v16 = vadd.f32 %v315_v54, %v243_v7  ;;  %v332_v18 = vadd.f32 %v316_v55, %v244_v36  ;;  %v3514_v7 = vld [vmem:[#allocation7 + $0x78] ss:$12 sps:$4 sm:$0xff]   ;;  %v4244_v49 = vld [vmem:[%s4743_s3 + $0xc] sm:$0xf] }
  0x5e   :  { %v1218_v19 = vld [vmem:[#allocation3 + $0x8] sm:$0xff]  ;;  %v333_v21 = vadd.f32 %v317_v60, %v245_v37  ;;  %v334_v22 = vadd.f32 %v318_v61, %v246_v38  ;;  %v335_v23 = vadd.f32 %v319_v62, %v247_v8  ;;  %v336_v24 = vadd.f32 %v320_v63, %v248_v39  ;;  %v4256_v60 = vld [vmem:[%s4743_s3 + $0x14] sm:$0xf]  ;;  %v4261_v61 = vld [vmem:[%s4743_s3 + $0x18] sm:$0xf] }
  0x5f   :  { %3466 = vmatpush3.msra.mxu1 %v1218_v19  ;;  %v337_v25 = vadd.f32 %v321_v14, %v249_v40  ;;  %v386_v27 = vmul.f32 %v4069_v30, %v4110_v13  ;;  %v387_v28 = vmul.f32 %v4069_v30, %v4115_v17  ;;  %v388_v29 = vmul.f32 %v4069_v30, %v4120_v43  ;;  %v3519_v8 = vld [vmem:[#allocation7 + $0x64] ss:$12 sps:$4 sm:$0xff]  }
  0x60   :  { %3468 = vmatmul.mubr.msk.f32.vlgmr.msra.gmra.mxu1 %vm1141_vm9, %v3203_v50  ;;  %1856 = vmatprep.subr.bf16.mxu1 %v3510_v59  ;;  %v389_v31 = vmul.f32 %v4069_v30, %v4125_v44  ;;  %v390_v4 = vmul.f32 %v4069_v30, %v4132_v53  ;;  %v391_v13 = vmul.f32 %v4069_v30, %v4140_v56  ;;  %v82_v17 = vand.u32 127, %v4021_v10  ;;  %v4229_v56 = vld [vmem:[%s4743_s3] sm:$0xf]  ;;  %v4249_v50 = vld [vmem:[%s4743_s3 + $0x10] sm:$0xf] }
  0x61   :  { %1857 = vmatpush1.bf16.msra.mxu1 %v3508_v1  ;;  %v392_v43 = vmul.f32 %v4069_v30, %v4145_v57  ;;  %v393_v5 = vmul.f32 %v4069_v30, %v4150_v58  ;;  %v402_v33 = vrot.slane %v386_v27, 3  ;;  %v403_v34 = vrot.slane %v387_v28, 3  ;;  %v3522_v27 = vld [vmem:[#allocation7 + $0x4c] ss:$12 sps:$4 sm:$0xff]  }
  0x62   :  { %1858 = vmatprep.subr.bf16.mxu1 %v3513_v20  ;;  %v404_v44 = vrot.slane %v388_v29, 3  ;;  %v405_v6 = vrot.slane %v389_v31, 3  ;;  %v406_v35 = vrot.slane %v390_v4, 3  ;;  %v407_v53 = vrot.slane %v391_v13, 3  ;;  %v3535_v10 = vld [vmem:[#allocation7] ss:$12 sps:$4 sm:$0xff]  }
  0x63   :  { %v408_v36 = vrot.slane %v392_v43, 3  ;;  %v409_v37 = vrot.slane %v393_v5, 3  ;;  %v418_v38 = vadd.f32 %v402_v33, %v330_v15  ;;  %v419_v57 = vadd.f32 %v403_v34, %v331_v16  ;;  %v4270_v16 = vld [vmem:[%s4743_s3 + $0x1c] sm:$0xf]  ;;  %v3520_v43 = vld [vmem:[#allocation7 + $0x48] ss:$12 sps:$4 sm:$0xff]  }
  0x64   :  { %v420_v58 = vadd.f32 %v404_v44, %v332_v18  ;;  %v421_v39 = vadd.f32 %v405_v6, %v333_v21  ;;  %v422_v40 = vadd.f32 %v406_v35, %v334_v22  ;;  %v423_v41 = vadd.f32 %v407_v53, %v335_v23  ;;  %v3517_v21 = vld [vmem:[#allocation7 + $0x60] ss:$12 sps:$4 sm:$0xff]  }
  0x65   :  { %1859 = vmatpush1.bf16.msra.mxu1 %v3511_v3  ;;  %v424_v46 = vadd.f32 %v408_v36, %v336_v24  ;;  %v425_v47 = vadd.f32 %v409_v37, %v337_v25  ;;  %v466_v45 = vrot.slane %v419_v57, 7  ;;  %v835_v51 = vmul.f32 %v4229_v56, %v4017_v9  ;;  %v3525_v36 = vld [vmem:[#allocation7 + $0x34] ss:$12 sps:$4 sm:$0xff]  }
  0x66   :  { %1860 = vmatprep.subr.bf16.mxu1 %v3516_v32  ;;  %v468_v52 = vrot.slane %v420_v58, 6  ;;  %v470_v54 = vrot.slane %v421_v39, 5  ;;  %v472_v55 = vrot.slane %v422_v40, 4  ;;  %v474_v59 = vrot.slane %v423_v41, 3 }
  0x67   :  { %v467_v62 = vsel %vm435_vm1, %v466_v45, %v418_v38  ;;  %v476_v63 = vrot.slane %v424_v46, 2  ;;  %v478_v1 = vrot.slane %v425_v47, 1  ;;  %v836_v14 = vmul.f32 %v4234_v42, %v4017_v9 }
  0x68   :  { %v469_v15 = vsel %vm438_vm2, %v468_v52, %v467_v62  ;;  %v837_v18 = vmul.f32 %v4239_v48, %v4017_v9  ;;  %v838_v19 = vmul.f32 %v4244_v49, %v4017_v9  ;;  %v839_v20 = vmul.f32 %v4249_v50, %v4017_v9  ;;  %v3523_v52 = vld [vmem:[#allocation7 + $0x30] ss:$12 sps:$4 sm:$0xff]  }
  0x69   :  { %1861 = vmatpush1.bf16.msra.mxu1 %v3514_v7  ;;  %v471_v22 = vsel %vm441_vm3, %v470_v54, %v469_v15  ;;  %v840_v23 = vmul.f32 %v4256_v60, %v4017_v9  ;;  %v841_v24 = vmul.f32 %v4261_v61, %v4017_v9  ;;  %v842_v25 = vmul.f32 %v4270_v16, %v4017_v9  ;;  %v1139_v62 = vld [vmem:[%s4744_s4] sm:$0xff] }
  0x6a   :  { %1862 = vmatprep.subr.bf16.mxu1 %v3519_v8  ;;  %v473_v28 = vsel %vm444_vm4, %v472_v55, %v471_v22  ;;  %v891_v29 = vmul.f32 %v4229_v56, %v4026_v12  ;;  %v892_v3 = vmul.f32 %v4234_v42, %v4026_v12  ;;  %v893_v31 = vmul.f32 %v4239_v48, %v4026_v12  ;;  %v3531_v22 = vld [vmem:[#allocation7 + $0x1c] ss:$12 sps:$4 sm:$0xff]  }
  0x6b   :  { %v475_v4 = vsel %vm447_vm5, %v474_v59, %v473_v28  ;;  %v894_v13 = vmul.f32 %v4244_v49, %v4026_v12  ;;  %v895_v9 = vmul.f32 %v4249_v50, %v4026_v12  ;;  %v896_v32 = vmul.f32 %v4256_v60, %v4026_v12  ;;  %v3529_v28 = vld [vmem:[#allocation7 + $0x18] ss:$12 sps:$4 sm:$0xff]  }
  0x6c   :  { %v477_v5 = vsel %vm450_vm6, %v476_v63, %v475_v4  ;;  %v897_v33 = vmul.f32 %v4261_v61, %v4026_v12  ;;  %v898_v34 = vmul.f32 %v4270_v16, %v4026_v12  ;;  %v907_v44 = vrot.slane %v891_v29, 1 }
  0x6d   :  { %1863 = vmatpush1.bf16.msra.mxu1 %v3517_v21  ;;  %v479_v6 = vsel %vm453_vm7, %v478_v1, %v477_v5  ;;  %v908_v35 = vrot.slane %v892_v3, 1  ;;  %v909_v53 = vrot.slane %v893_v31, 1  ;;  %v910_v7 = vrot.slane %v894_v13, 1  ;;  %v3537_v13 = vld [vmem:[#allocation7 + $0x4] ss:$12 sps:$4 sm:$0xff]  }
  0x6e   :  { %1864 = vmatprep.subr.bf16.mxu1 %v3522_v27  ;;  %481 = vst.msk [vmem:[#allocation3] sm:$0xff] %vm456_vm10, %v479_v6  ;;  %v911_v37 = vrot.slane %v895_v9, 1  ;;  %v912_v38 = vrot.slane %v896_v32, 1  ;;  %v913_v57 = vrot.slane %v897_v33, 1  ;;  %v914_v8 = vrot.slane %v898_v34, 1 }
  0x6f   :  { %v923_v58 = vadd.f32 %v907_v44, %v835_v51  ;;  %v924_v12 = vadd.f32 %v908_v35, %v836_v14  ;;  %v925_v39 = vadd.f32 %v909_v53, %v837_v18  ;;  %v926_v40 = vadd.f32 %v910_v7, %v838_v19 }
  0x70   :  { %v927_v41 = vadd.f32 %v911_v37, %v839_v20  ;;  %v928_v46 = vadd.f32 %v912_v38, %v840_v23  ;;  %v929_v47 = vadd.f32 %v913_v57, %v841_v24  ;;  %v930_v45 = vadd.f32 %v914_v8, %v842_v25 }
  0x71   :  { %1865 = vmatpush1.bf16.msra.mxu1 %v3520_v43  ;;  %v971_v54 = vmul.f32 %v4229_v56, %v4061_v26  ;;  %v972_v55 = vmul.f32 %v4234_v42, %v4061_v26  ;;  %v973_v51 = vmul.f32 %v4239_v48, %v4061_v26  ;;  %v974_v59 = vmul.f32 %v4244_v49, %v4061_v26 }
  0x72   :  { %1866 = vmatprep.subr.bf16.mxu1 %v3525_v36  ;;  %v975_v63 = vmul.f32 %v4249_v50, %v4061_v26  ;;  %v976_v1 = vmul.f32 %v4256_v60, %v4061_v26  ;;  %v977_v14 = vmul.f32 %v4261_v61, %v4061_v26  ;;  %v978_v15 = vmul.f32 %v4270_v16, %v4061_v26 }
  0x73   :  { %v987_v18 = vrot.slane %v971_v54, 2  ;;  %v988_v19 = vrot.slane %v972_v55, 2  ;;  %v989_v20 = vrot.slane %v973_v51, 2  ;;  %v990_v21 = vrot.slane %v974_v59, 2  ;;  %v3541_v51 = vld [vmem:[#allocation7 + $0x168] ss:$12 sps:$4 sm:$0xff]  }
  0x74   :  { %v991_v23 = vrot.slane %v975_v63, 2  ;;  %v992_v24 = vrot.slane %v976_v1, 2  ;;  %v993_v25 = vrot.slane %v977_v14, 2  ;;  %v994_v27 = vrot.slane %v978_v15, 2 }
  0x75   :  { %v1140_v29 = vld [vmem:[#allocation3] sm:$0xff]  ;;  %v1003_v3 = vadd.f32 %v987_v18, %v923_v58  ;;  %v1004_v31 = vadd.f32 %v988_v19, %v924_v12  ;;  %v1005_v4 = vadd.f32 %v989_v20, %v925_v39  ;;  %v1006_v26 = vadd.f32 %v990_v21, %v926_v40  ;;  %1867 = vmatpush1.bf16.msra.mxu1 %v3523_v52  ;;  %v3549_v20 = vld [vmem:[#allocation7 + $0x154] ss:$12 sps:$4 sm:$0xff]  }
  0x76   :  { %3461 = vmatpush3.msra.mxu0 %v1140_v29  ;;  %v1007_v9 = vadd.f32 %v991_v23, %v927_v41  ;;  %v1008_v32 = vadd.f32 %v992_v24, %v928_v46  ;;  %v1009_v43 = vadd.f32 %v993_v25, %v929_v47  ;;  %v1010_v5 = vadd.f32 %v994_v27, %v930_v45  ;;  %v3543_v45 = vld [vmem:[#allocation7 + $0x16c] ss:$12 sps:$4 sm:$0xff]  }
  0x77   :  { %3463 = vmatmul.mubr.msk.f32.vlgmr.msra.gmra.mxu0 %vm1141_vm9, %v1139_v62  ;;  %3470 = vmatprep.subr.mxu0 %v3923_v0  ;;  %v1051_v33 = vmul.f32 %v4229_v56, %v4069_v30  ;;  %v1052_v34 = vmul.f32 %v4234_v42, %v4069_v30  ;;  %v1053_v44 = vmul.f32 %v4239_v48, %v4069_v30  ;;  %vm4347_vm11 = vcmp.eq.s32.totalorder %v82_v17, 127 }
  0x78   :  { %v1054_v35 = vmul.f32 %v4244_v49, %v4069_v30  ;;  %v1055_v53 = vmul.f32 %v4249_v50, %v4069_v30  ;;  %v1056_v7 = vmul.f32 %v4256_v60, %v4069_v30  ;;  %v1057_v36 = vmul.f32 %v4261_v61, %v4069_v30  ;;  %3472 = vmatprep.mubr.msk.f32.mxu0 %vm3924_vm0, %v3923_v0 }
  0x79   :  { %v1058_v17 = vmul.f32 %v4270_v16, %v4069_v30  ;;  %v1067_v37 = vrot.slane %v1051_v33, 3  ;;  %v1068_v38 = vrot.slane %v1052_v34, 3  ;;  %v1069_v57 = vrot.slane %v1053_v44, 3  ;;  %1868 = vmatprep.subr.bf16.mxu1 %v3531_v22 }
  0x7a   :  { %v1070_v8 = vrot.slane %v1054_v35, 3  ;;  %v1071_v58 = vrot.slane %v1055_v53, 3  ;;  %v1072_v12 = vrot.slane %v1056_v7, 3  ;;  %v1073_v39 = vrot.slane %v1057_v36, 3  ;;  %1869 = vmatpush1.bf16.msra.mxu1 %v3529_v28  ;;  %v3553_v7 = vld [vmem:[#allocation7 + $0x138] ss:$12 sps:$4 sm:$0xff]  }
  0x7b   :  { %v1074_v40 = vrot.slane %v1058_v17, 3  ;;  %v1083_v41 = vadd.f32 %v1067_v37, %v1003_v3  ;;  %v1084_v46 = vadd.f32 %v1068_v38, %v1004_v31  ;;  %v1085_v47 = vadd.f32 %v1069_v57, %v1005_v4  ;;  %1870 = vmatprep.subr.bf16.mxu1 %v3537_v13  ;;  %v3547_v31 = vld [vmem:[#allocation7 + $0x150] ss:$12 sps:$4 sm:$0xff]  }
  0x7c   :  { %v1086_v30 = vadd.f32 %v1070_v8, %v1006_v26  ;;  %v1087_v52 = vadd.f32 %v1071_v58, %v1007_v9  ;;  %v1088_v54 = vadd.f32 %v1072_v12, %v1008_v32  ;;  %v1089_v55 = vadd.f32 %v1073_v39, %v1009_v43  ;;  %v3555_v32 = vld [vmem:[#allocation7 + $0x13c] ss:$12 sps:$4 sm:$0xff]   ;;  %v3561_v38 = vld [vmem:[#allocation7 + $0x124] ss:$12 sps:$4 sm:$0xff]  }
  0x7d   :  { %v1090_v59 = vadd.f32 %v1074_v40, %v1010_v5  ;;  %v1123_v62 = vrot.slane %v1084_v46, 7  ;;  %v1125_v63 = vrot.slane %v1085_v47, 6  ;;  %v105_v1 = vsel %vm4347_vm11, 1.0, %v3923_v0 }
  0x7e   :  { %v1127_v14 = vrot.slane %v1086_v30, 5  ;;  %v1129_v15 = vrot.slane %v1087_v52, 4  ;;  %v1131_v18 = vrot.slane %v1088_v54, 3  ;;  %v1133_v19 = vrot.slane %v1089_v55, 2  ;;  %1871 = vmatpush1.bf16.msra.mxu1 %v3535_v10  ;;  %108 = vst [vmem:[#allocation2 + $0x10] sm:$0xff] %v105_v1 }
  0x7f   :  { %v1124_v21 = vsel %vm435_vm1, %v1123_v62, %v1083_v41  ;;  %v1135_v22 = vrot.slane %v1090_v59, 1  ;;  %1872 = vmatprep.subr.bf16.mxu1 %v3543_v45  ;;  %v4379_v23 = vstv %s124_s30  ;;  %v4381_v24 = vstv %s164_s0  ;;  %v3559_v52 = vld [vmem:[#allocation7 + $0x120] ss:$12 sps:$4 sm:$0xff]  }
  0x80   :  { %v1126_v25 = vsel %vm438_vm2, %v1125_v63, %v1124_v21  ;;  %v4384_v27 = vstv %s252_s8  ;;  %v4386_v28 = vstv %s340_s9  ;;  %v819_v29 = vmul.f32 %v4229_v56, %v4379_v23  ;;  %v3528_v62 = vld [vmem:[#allocation7 + $0x22c] ss:$12 sps:$4 sm:$0xff]  }
  0x81   :  { %v1128_v3 = vsel %vm441_vm3, %v1127_v14, %v1126_v25  ;;  %v820_v4 = vmul.f32 %v4234_v42, %v4379_v23  ;;  %v821_v26 = vmul.f32 %v4239_v48, %v4379_v23  ;;  %v822_v13 = vmul.f32 %v4244_v49, %v4379_v23 }
  0x82   :  { %v1130_v9 = vsel %vm444_vm4, %v1129_v15, %v1128_v3  ;;  %1873 = vmatpush2.bf16.msra.mxu1 %v3541_v51  ;;  %v823_v43 = vmul.f32 %v4249_v50, %v4379_v23  ;;  %v824_v5 = vmul.f32 %v4256_v60, %v4379_v23  ;;  %v825_v33 = vmul.f32 %v4261_v61, %v4379_v23  ;;  %v3534_v3 = vld [vmem:[#allocation7 + $0x214] ss:$12 sps:$4 sm:$0xff]  }
  0x83   :  { %v1132_v34 = vsel %vm447_vm5, %v1131_v18, %v1130_v9  ;;  %1874 = vmatprep.subr.bf16.mxu1 %v3549_v20  ;;  %v826_v44 = vmul.f32 %v4270_v16, %v4379_v23  ;;  %v851_v6 = vmul.f32 %v4229_v56, %v4381_v24  ;;  %v852_v35 = vmul.f32 %v4234_v42, %v4381_v24  ;;  %v3526_v18 = vld [vmem:[#allocation7 + $0x228] ss:$12 sps:$4 sm:$0xff]   ;;  %v3567_v20 = vld [vmem:[#allocation7 + $0x10c] ss:$12 sps:$4 sm:$0xff]  }
  0x84   :  { %v1134_v53 = vsel %vm450_vm6, %v1133_v19, %v1132_v34  ;;  %v853_v36 = vmul.f32 %v4239_v48, %v4381_v24  ;;  %v854_v10 = vmul.f32 %v4244_v49, %v4381_v24  ;;  %v855_v17 = vmul.f32 %v4249_v50, %v4381_v24  ;;  %v3205_v19 = vld [vmem:[%s4744_s4 + $0x10] sm:$0xff]  ;;  %v3565_v9 = vld [vmem:[#allocation7 + $0x108] ss:$12 sps:$4 sm:$0xff]  }
  0x85   :  { %v1136_v37 = vsel %vm453_vm7, %v1135_v22, %v1134_v53  ;;  %v856_v57 = vmul.f32 %v4256_v60, %v4381_v24  ;;  %v857_v8 = vmul.f32 %v4261_v61, %v4381_v24  ;;  %v858_v58 = vmul.f32 %v4270_v16, %v4381_v24 }
  0x86   :  { %1138 = vst.msk [vmem:[#allocation3 + $0x10] sm:$0xff] %vm456_vm10, %v1136_v37  ;;  %1875 = vmatpush2.bf16.msra.mxu1 %v3547_v31  ;;  %v867_v12 = vrot.slane %v851_v6, 1  ;;  %v868_v39 = vrot.slane %v852_v35, 1  ;;  %v869_v40 = vrot.slane %v853_v36, 1  ;;  %v870_v41 = vrot.slane %v854_v10, 1 }
  0x87   :  { %1876 = vmatprep.subr.bf16.mxu1 %v3555_v32  ;;  %v871_v46 = vrot.slane %v855_v17, 1  ;;  %v872_v47 = vrot.slane %v856_v57, 1  ;;  %v873_v45 = vrot.slane %v857_v8, 1  ;;  %v874_v30 = vrot.slane %v858_v58, 1  ;;  %v3532_v36 = vld [vmem:[#allocation7 + $0x210] ss:$12 sps:$4 sm:$0xff]  }
  0x88   :  { %v883_v54 = vadd.f32 %v867_v12, %v819_v29  ;;  %v884_v55 = vadd.f32 %v868_v39, %v820_v4  ;;  %v885_v51 = vadd.f32 %v869_v40, %v821_v26  ;;  %v886_v59 = vadd.f32 %v870_v41, %v822_v13  ;;  %v3540_v57 = vld [vmem:[#allocation7 + $0x1fc] ss:$12 sps:$4 sm:$0xff]  }
  0x89   :  { %v887_v63 = vadd.f32 %v871_v46, %v823_v43  ;;  %v888_v1 = vadd.f32 %v872_v47, %v824_v5  ;;  %v889_v14 = vadd.f32 %v873_v45, %v825_v33  ;;  %v890_v15 = vadd.f32 %v874_v30, %v826_v44  ;;  %v3573_v44 = vld [vmem:[#allocation7 + $0xf4] ss:$12 sps:$4 sm:$0xff]   ;;  %v3571_v39 = vld [vmem:[#allocation7 + $0xf0] ss:$12 sps:$4 sm:$0xff]  }
  0x8a   :  { %1877 = vmatpush2.bf16.msra.mxu1 %v3553_v7  ;;  %v931_v21 = vmul.f32 %v4229_v56, %v4384_v27  ;;  %v932_v22 = vmul.f32 %v4234_v42, %v4384_v27  ;;  %v933_v25 = vmul.f32 %v4239_v48, %v4384_v27  ;;  %v934_v29 = vmul.f32 %v4244_v49, %v4384_v27 }
  0x8b   :  { %1878 = vmatprep.subr.bf16.mxu1 %v3561_v38  ;;  %v935_v31 = vmul.f32 %v4249_v50, %v4384_v27  ;;  %v936_v4 = vmul.f32 %v4256_v60, %v4384_v27  ;;  %v937_v26 = vmul.f32 %v4261_v61, %v4384_v27  ;;  %v938_v13 = vmul.f32 %v4270_v16, %v4384_v27 }
  0x8c   :  { %v947_v32 = vrot.slane %v931_v21, 2  ;;  %v948_v43 = vrot.slane %v932_v22, 2  ;;  %v949_v5 = vrot.slane %v933_v25, 2  ;;  %v950_v33 = vrot.slane %v934_v29, 2  ;;  %v3583_v22 = vld [vmem:[#allocation7 + $0xc4] ss:$12 sps:$4 sm:$0xff]  }
  0x8d   :  { %v1295_v34 = vld [vmem:[#allocation3 + $0x10] sm:$0xff]  ;;  %v951_v6 = vrot.slane %v935_v31, 2  ;;  %v952_v35 = vrot.slane %v936_v4, 2  ;;  %v953_v53 = vrot.slane %v937_v26, 2  ;;  %v954_v7 = vrot.slane %v938_v13, 2 }
  0x8e   :  { %3471 = vmatpush3.msra.mxu0 %v1295_v34  ;;  %1879 = vmatpush2.bf16.msra.mxu1 %v3559_v52  ;;  %v963_v10 = vadd.f32 %v947_v32, %v883_v54  ;;  %v964_v17 = vadd.f32 %v948_v43, %v884_v55  ;;  %v965_v37 = vadd.f32 %v949_v5, %v885_v51  ;;  %v75_v38 = vand.u32 127, %v4024_v11  ;;  %v3578_v52 = vld [vmem:[#allocation7 + $0xdc] ss:$12 sps:$4 sm:$0xff]   ;;  %v3538_v55 = vld [vmem:[#allocation7 + $0x1f8] ss:$12 sps:$4 sm:$0xff]  }
  0x8f   :  { %1897 = vmatprep.subr.bf16.mxu0 %v3528_v62  ;;  %3473 = vmatmul.mubr.msk.f32.vlgmr.msra.gmra.mxu0 %vm1141_vm9, %v3205_v19  ;;  %v966_v8 = vadd.f32 %v950_v33, %v886_v59  ;;  %v967_v58 = vadd.f32 %v951_v6, %v887_v63  ;;  %v968_v12 = vadd.f32 %v952_v35, %v888_v1  ;;  %v3925_v47 = vmov 0   ;;  %v3546_v59 = vld [vmem:[#allocation7 + $0x1e4] ss:$12 sps:$4 sm:$0xff]   ;;  %v3552_v4 = vld [vmem:[#allocation7 + $0x1cc] ss:$12 sps:$4 sm:$0xff]  }
  0x90   :  { %1898 = vmatpush1.bf16.msra.mxu0 %v3526_v18  ;;  %1880 = vmatprep.subr.bf16.mxu1 %v3567_v20  ;;  %v969_v40 = vadd.f32 %v953_v53, %v889_v14  ;;  %v970_v41 = vadd.f32 %v954_v7, %v890_v15  ;;  %v1011_v46 = vmul.f32 %v4229_v56, %v4386_v28  ;;  %vm101_vm12 = vcmp.eq.s32.totalorder %v75_v38, 127  ;;  %v3576_v19 = vld [vmem:[#allocation7 + $0xd8] ss:$12 sps:$4 sm:$0xff]   ;;  %v4468_v32 = vld [vmem:[%s4742_s2] sm:$0xf] }
  0x91   :  { %1899 = vmatprep.subr.bf16.mxu0 %v3534_v3  ;;  %1929 = vmatprep.mubr.bf16.mxu0 %v3925_v47  ;;  %v1012_v11 = vmul.f32 %v4234_v42, %v4386_v28  ;;  %v1013_v45 = vmul.f32 %v4239_v48, %v4386_v28  ;;  %v1014_v30 = vmul.f32 %v4244_v49, %v4386_v28  ;;  %v104_v54 = vsel %vm101_vm12, 1.0, %v3923_v0  ;;  %v3581_v6 = vld [vmem:[#allocation7 + $0xc0] ss:$12 sps:$4 sm:$0xff]   ;;  %v4476_v53 = vld [vmem:[%s4742_s2 + $0x4] sm:$0xf] }
  0x92   :  { %1881 = vmatpush2.bf16.msra.mxu1 %v3565_v9  ;;  %v1015_v56 = vmul.f32 %v4249_v50, %v4386_v28  ;;  %v1016_v51 = vmul.f32 %v4256_v60, %v4386_v28  ;;  %v1017_v42 = vmul.f32 %v4261_v61, %v4386_v28  ;;  %v1018_v48 = vmul.f32 %v4270_v16, %v4386_v28  ;;  %v3544_v16 = vld [vmem:[#allocation7 + $0x1e0] ss:$12 sps:$4 sm:$0xff]   ;;  %v3550_v38 = vld [vmem:[#allocation7 + $0x1c8] ss:$12 sps:$4 sm:$0xff]  }
  0x93   :  { %107 = vst [vmem:[#allocation2 + $0x8] sm:$0xff] %v104_v54  ;;  %1882 = vmatprep.subr.bf16.mxu1 %v3573_v44  ;;  %v1027_v49 = vrot.slane %v1011_v46, 3  ;;  %v1028_v62 = vrot.slane %v1012_v11, 3  ;;  %v1029_v63 = vrot.slane %v1013_v45, 3  ;;  %v1030_v1 = vrot.slane %v1014_v30, 3 }
  0x94   :  { %1900 = vmatpush1.bf16.msra.mxu0 %v3532_v36  ;;  %v1031_v14 = vrot.slane %v1015_v56, 3  ;;  %v1032_v15 = vrot.slane %v1016_v51, 3  ;;  %v1033_v50 = vrot.slane %v1017_v42, 3  ;;  %v1034_v18 = vrot.slane %v1018_v48, 3  ;;  %v4483_v36 = vld [vmem:[%s4742_s2 + $0x8] sm:$0xf] }
  0x95   :  { %1901 = vmatprep.subr.bf16.mxu0 %v3540_v57  ;;  %v1043_v60 = vadd.f32 %v1027_v49, %v963_v10  ;;  %v1044_v20 = vadd.f32 %v1028_v62, %v964_v17  ;;  %v1045_v61 = vadd.f32 %v1029_v63, %v965_v37  ;;  %v1046_v21 = vadd.f32 %v1030_v1, %v966_v8  ;;  %v4490_v17 = vld [vmem:[%s4742_s2 + $0xc] sm:$0xf]  ;;  %v4498_v8 = vld [vmem:[%s4742_s2 + $0x10] sm:$0xf]  ;;  %v4520_v45 = vld [vmem:[%s4742_s2 + $0x1c] sm:$0xf] }
  0x96   :  { %1883 = vmatpush2.bf16.msra.mxu1 %v3571_v39  ;;  %v1047_v25 = vadd.f32 %v1031_v14, %v967_v58  ;;  %v1048_v29 = vadd.f32 %v1032_v15, %v968_v12  ;;  %v1049_v3 = vadd.f32 %v1033_v50, %v969_v40  ;;  %v1050_v31 = vadd.f32 %v1034_v18, %v970_v41  ;;  %v4505_v12 = vld [vmem:[%s4742_s2 + $0x14] sm:$0xf]  ;;  %v4512_v40 = vld [vmem:[%s4742_s2 + $0x18] sm:$0xf]  ;;  %v3558_v46 = vld [vmem:[#allocation7 + $0x1b4] ss:$12 sps:$4 sm:$0xff]  }
  0x97   :  { %v1099_v26 = vrot.slane %v1044_v20, 7  ;;  %v1101_v13 = vrot.slane %v1045_v61, 6  ;;  %v1103_v9 = vrot.slane %v1046_v21, 5  ;;  %1884 = vmatprep.subr.bf16.mxu1 %v3578_v52  ;;  %v490_v43 = vmul.f32 %v4468_v32, %v4379_v23  ;;  %v3556_v63 = vld [vmem:[#allocation7 + $0x1b0] ss:$12 sps:$4 sm:$0xff]  }
  0x98   :  { %1902 = vmatpush1.bf16.msra.mxu0 %v3538_v55  ;;  %v1105_v5 = vrot.slane %v1047_v25, 4  ;;  %v1107_v33 = vrot.slane %v1048_v29, 3  ;;  %v1109_v34 = vrot.slane %v1049_v3, 2  ;;  %v1111_v44 = vrot.slane %v1050_v31, 1  ;;  %v3564_v18 = vld [vmem:[#allocation7 + $0x19c] ss:$12 sps:$4 sm:$0xff]  }
  0x99   :  { %1903 = vmatprep.subr.bf16.mxu0 %v3546_v59  ;;  %v1100_v35 = vsel %vm435_vm1, %v1099_v26, %v1043_v60  ;;  %v491_v7 = vmul.f32 %v4476_v53, %v4379_v23  ;;  %v492_v10 = vmul.f32 %v4483_v36, %v4379_v23  ;;  %v493_v37 = vmul.f32 %v4490_v17, %v4379_v23 }
  0x9a   :  { %v1102_v57 = vsel %vm438_vm2, %v1101_v13, %v1100_v35  ;;  %1885 = vmatpush2.bf16.msra.mxu1 %v3576_v19  ;;  %v494_v58 = vmul.f32 %v4498_v8, %v4379_v23  ;;  %v495_v39 = vmul.f32 %v4505_v12, %v4379_v23  ;;  %v496_v41 = vmul.f32 %v4512_v40, %v4379_v23  ;;  %v3570_v35 = vld [vmem:[#allocation7 + $0x184] ss:$12 sps:$4 sm:$0xff]  }
  0x9b   :  { %v1104_v11 = vsel %vm441_vm3, %v1103_v9, %v1102_v57  ;;  %1886 = vmatprep.subr.bf16.mxu1 %v3583_v22  ;;  %v497_v30 = vmul.f32 %v4520_v45, %v4379_v23  ;;  %v522_v52 = vmul.f32 %v4468_v32, %v4381_v24  ;;  %v523_v54 = vmul.f32 %v4476_v53, %v4381_v24 }
  0x9c   :  { %1904 = vmatpush1.bf16.msra.mxu0 %v3544_v16  ;;  %v1106_v55 = vsel %vm444_vm4, %v1105_v5, %v1104_v11  ;;  %v524_v56 = vmul.f32 %v4483_v36, %v4381_v24  ;;  %v525_v51 = vmul.f32 %v4490_v17, %v4381_v24  ;;  %v526_v42 = vmul.f32 %v4498_v8, %v4381_v24 }
  0x9d   :  { %1905 = vmatprep.subr.bf16.mxu0 %v3552_v4  ;;  %v1108_v48 = vsel %vm447_vm5, %v1107_v33, %v1106_v55  ;;  %v527_v59 = vmul.f32 %v4505_v12, %v4381_v24  ;;  %v528_v49 = vmul.f32 %v4512_v40, %v4381_v24  ;;  %v529_v62 = vmul.f32 %v4520_v45, %v4381_v24  ;;  %v3574_v55 = vld [vmem:[#allocation7 + $0x170] ss:$12 sps:$4 sm:$0xff]  }
  0x9e   :  { %v1110_v1 = vsel %vm450_vm6, %v1109_v34, %v1108_v48  ;;  %1887 = vmatpush2.bf16.msra.mxu1 %v3581_v6  ;;  %v538_v14 = vrot.slane %v522_v52, 1  ;;  %v539_v15 = vrot.slane %v523_v54, 1  ;;  %v540_v50 = vrot.slane %v524_v56, 1  ;;  %v3562_v6 = vld [vmem:[#allocation7 + $0x198] ss:$12 sps:$4 sm:$0xff]  }
  0x9f   :  { %v1112_v19 = vsel %vm453_vm7, %v1111_v44, %v1110_v1  ;;  %v541_v60 = vrot.slane %v525_v51, 1  ;;  %v542_v20 = vrot.slane %v526_v42, 1  ;;  %v543_v61 = vrot.slane %v527_v59, 1  ;;  %3475 = vmatprep.subr.bf16.mxu1 %v3923_v0 }
  0xa0   :  { %1906 = vmatpush1.bf16.msra.mxu0 %v3550_v38  ;;  %1114 = vst.msk [vmem:[#allocation2 + $0x10] sm:$0xff] %vm456_vm10, %v1112_v19  ;;  %v544_v21 = vrot.slane %v528_v49, 1  ;;  %v545_v22 = vrot.slane %v529_v62, 1  ;;  %v554_v16 = vadd.f32 %v538_v14, %v490_v43  ;;  %v555_v25 = vadd.f32 %v539_v15, %v491_v7  ;;  %v3575_v19 = vld [vmem:[#allocation7 + $0xb0] ss:$12 sps:$4 sm:$0xff]  }
  0xa1   :  { %1907 = vmatprep.subr.bf16.mxu0 %v3558_v46  ;;  %v556_v29 = vadd.f32 %v540_v50, %v492_v10  ;;  %v557_v3 = vadd.f32 %v541_v60, %v493_v37  ;;  %v558_v31 = vadd.f32 %v542_v20, %v494_v58  ;;  %v559_v4 = vadd.f32 %v543_v61, %v495_v39  ;;  %v3568_v46 = vld [vmem:[#allocation7 + $0x180] ss:$12 sps:$4 sm:$0xff]   ;;  %v3579_v61 = vld [vmem:[#allocation7 + $0x158] ss:$12 sps:$4 sm:$0xff]  }
  0xa2   :  { %v560_v26 = vadd.f32 %v544_v21, %v496_v41  ;;  %v561_v13 = vadd.f32 %v545_v22, %v497_v30  ;;  %v602_v9 = vmul.f32 %v4468_v32, %v4384_v27  ;;  %v603_v5 = vmul.f32 %v4476_v53, %v4384_v27 }
  0xa3   :  { %v604_v33 = vmul.f32 %v4483_v36, %v4384_v27  ;;  %v605_v43 = vmul.f32 %v4490_v17, %v4384_v27  ;;  %v606_v34 = vmul.f32 %v4498_v8, %v4384_v27  ;;  %v607_v44 = vmul.f32 %v4505_v12, %v4384_v27 }
  0xa4   :  { %1908 = vmatpush1.bf16.msra.mxu0 %v3556_v63  ;;  %v608_v7 = vmul.f32 %v4512_v40, %v4384_v27  ;;  %v609_v10 = vmul.f32 %v4520_v45, %v4384_v27  ;;  %v618_v37 = vrot.slane %v602_v9, 2  ;;  %v619_v38 = vrot.slane %v603_v5, 2  ;;  %v3584_v5 = vld [vmem:[#allocation7 + $0x140] ss:$12 sps:$4 sm:$0xff]  }
  0xa5   :  { %1909 = vmatprep.subr.bf16.mxu0 %v3564_v18  ;;  %v620_v57 = vrot.slane %v604_v33, 2  ;;  %v621_v58 = vrot.slane %v605_v43, 2  ;;  %v622_v39 = vrot.slane %v606_v34, 2  ;;  %v623_v41 = vrot.slane %v607_v44, 2 }
  0xa6   :  { %v624_v11 = vrot.slane %v608_v7, 2  ;;  %v625_v30 = vrot.slane %v609_v10, 2  ;;  %v634_v52 = vadd.f32 %v618_v37, %v554_v16  ;;  %v635_v54 = vadd.f32 %v619_v38, %v555_v25  ;;  %v4588_v10 = vld [vmem:[%s4741_s1] sm:$0xf]  ;;  %v4596_v38 = vld [vmem:[%s4741_s1 + $0x4] sm:$0xf] }
  0xa7   :  { %v1372_v56 = vld [vmem:[#allocation2 + $0x10] sm:$0xff]  ;;  %v636_v51 = vadd.f32 %v620_v57, %v556_v29  ;;  %v637_v42 = vadd.f32 %v621_v58, %v557_v3  ;;  %v638_v48 = vadd.f32 %v622_v39, %v558_v31  ;;  %v639_v59 = vadd.f32 %v623_v41, %v559_v4  ;;  %v4603_v58 = vld [vmem:[%s4741_s1 + $0x8] sm:$0xf]  ;;  %v4610_v41 = vld [vmem:[%s4741_s1 + $0xc] sm:$0xf] }
  0xa8   :  { %1910 = vmatpush1.bf16.msra.mxu0 %v3562_v6  ;;  %v4563_v49 = vpack.c.bf16 %v1372_v56, %v1372_v56  ;;  %v640_v62 = vadd.f32 %v624_v11, %v560_v26  ;;  %v641_v63 = vadd.f32 %v625_v30, %v561_v13  ;;  %v682_v1 = vmul.f32 %v4468_v32, %v4386_v28  ;;  %v3585_v30 = vld [vmem:[#allocation7 + $0x80] ss:$12 sps:$4 sm:$0xff]  }
  0xa9   :  { %1911 = vmatprep.subr.bf16.mxu0 %v3570_v35  ;;  %v683_v14 = vmul.f32 %v4476_v53, %v4386_v28  ;;  %v684_v15 = vmul.f32 %v4483_v36, %v4386_v28  ;;  %v685_v50 = vmul.f32 %v4490_v17, %v4386_v28  ;;  %v686_v18 = vmul.f32 %v4498_v8, %v4386_v28 }
  0xaa   :  { %v687_v60 = vmul.f32 %v4505_v12, %v4386_v28  ;;  %v688_v32 = vmul.f32 %v4512_v40, %v4386_v28  ;;  %v689_v20 = vmul.f32 %v4520_v45, %v4386_v28  ;;  %v698_v53 = vrot.slane %v682_v1, 3  ;;  %v3580_v40 = vld [vmem:[#allocation7 + $0x98] ss:$12 sps:$4 sm:$0xff]  }
  0xab   :  { %v699_v21 = vrot.slane %v683_v14, 3  ;;  %v700_v36 = vrot.slane %v684_v15, 3  ;;  %v701_v22 = vrot.slane %v685_v50, 3  ;;  %v702_v16 = vrot.slane %v686_v18, 3  ;;  %v3587_v14 = vld [vmem:[#allocation7 + $0x128] ss:$12 sps:$4 sm:$0xff]  }
  0xac   :  { %1912 = vmatpush1.bf16.msra.mxu0 %v3568_v46  ;;  %v703_v17 = vrot.slane %v687_v60, 3  ;;  %v704_v25 = vrot.slane %v688_v32, 3  ;;  %v705_v8 = vrot.slane %v689_v20, 3  ;;  %v714_v29 = vadd.f32 %v698_v53, %v634_v52  ;;  %v4618_v52 = vld [vmem:[%s4741_s1 + $0x10] sm:$0xf] }
  0xad   :  { %3429 = vmatprep.subr.bf16.mxu0 %v3574_v55  ;;  %v715_v3 = vadd.f32 %v699_v21, %v635_v54  ;;  %v716_v12 = vadd.f32 %v700_v36, %v636_v51  ;;  %v717_v31 = vadd.f32 %v701_v22, %v637_v42  ;;  %v718_v4 = vadd.f32 %v702_v16, %v638_v48  ;;  %v4625_v55 = vld [vmem:[%s4741_s1 + $0x14] sm:$0xf]  ;;  %v4632_v51 = vld [vmem:[%s4741_s1 + $0x18] sm:$0xf] }
  0xae   :  { %v719_v26 = vadd.f32 %v703_v17, %v639_v59  ;;  %v720_v13 = vadd.f32 %v704_v25, %v640_v62  ;;  %v721_v45 = vadd.f32 %v705_v8, %v641_v63  ;;  %v103_v9 = vsel %vm100_vm13, 1.0, %v3923_v0  ;;  %v4640_v59 = vld [vmem:[%s4741_s1 + $0x1c] sm:$0xf] }
  0xaf   :  { %1930 = vmatmul.mubr.bf16.vlgmr.msra.gmra.mxu0 %v4563_v49  ;;  %v770_v33 = vrot.slane %v715_v3, 7  ;;  %v772_v43 = vrot.slane %v716_v12, 6  ;;  %v774_v34 = vrot.slane %v717_v31, 5  ;;  %v776_v44 = vrot.slane %v718_v4, 4  ;;  %106 = vst [vmem:[#allocation2] sm:$0xff] %v103_v9 }
  0xb0   :  { %3430 = vmatpush3.bf16.msra.mxu0 %v3575_v19  ;;  %v778_v6 = vrot.slane %v719_v26, 3  ;;  %v780_v35 = vrot.slane %v720_v13, 2  ;;  %v782_v7 = vrot.slane %v721_v45, 1  ;;  %v129_v2 = vmul.f32 %v4588_v10, %v4379_v23  ;;  %v3588_v31 = vld [vmem:[#allocation7 + $0x68] ss:$12 sps:$4 sm:$0xff]  }
  0xb1   :  { %3431 = vmatprep.subr.bf16.mxu0 %v3579_v61  ;;  %v771_v37 = vsel %vm435_vm1, %v770_v33, %v714_v29  ;;  %v130_v57 = vmul.f32 %v4596_v38, %v4379_v23  ;;  %v131_v39 = vmul.f32 %v4603_v58, %v4379_v23  ;;  %v132_v46 = vmul.f32 %v4610_v41, %v4379_v23  ;;  %v3590_v13 = vld [vmem:[#allocation7 + $0x110] ss:$12 sps:$4 sm:$0xff]  }
  0xb2   :  { %v773_v11 = vsel %vm438_vm2, %v772_v43, %v771_v37  ;;  %v133_v54 = vmul.f32 %v4618_v52, %v4379_v23  ;;  %v134_v56 = vmul.f32 %v4625_v55, %v4379_v23  ;;  %v135_v42 = vmul.f32 %v4632_v51, %v4379_v23 }
  0xb3   :  { %v775_v48 = vsel %vm441_vm3, %v774_v34, %v773_v11  ;;  %v136_v62 = vmul.f32 %v4640_v59, %v4379_v23  ;;  %v169_v63 = vmul.f32 %v4588_v10, %v4381_v24  ;;  %v170_v1 = vmul.f32 %v4596_v38, %v4381_v24 }
  0xb4   :  { %3432 = vmatpush3.bf16.msra.mxu0 %v3580_v40  ;;  %v777_v15 = vsel %vm444_vm4, %v776_v44, %v775_v48  ;;  %v171_v50 = vmul.f32 %v4603_v58, %v4381_v24  ;;  %v172_v18 = vmul.f32 %v4610_v41, %v4381_v24  ;;  %v173_v19 = vmul.f32 %v4618_v52, %v4381_v24 }
  0xb5   :  { %3433 = vmatprep.subr.bf16.mxu0 %v3584_v5  ;;  %v779_v23 = vsel %vm447_vm5, %v778_v6, %v777_v15  ;;  %v174_v60 = vmul.f32 %v4625_v55, %v4381_v24  ;;  %v175_v32 = vmul.f32 %v4632_v51, %v4381_v24  ;;  %v176_v20 = vmul.f32 %v4640_v59, %v4381_v24 }
  0xb6   :  { %v781_v53 = vsel %vm450_vm6, %v780_v35, %v779_v23  ;;  %v185_v61 = vrot.slane %v169_v63, 1  ;;  %v186_v21 = vrot.slane %v170_v1, 1  ;;  %v187_v36 = vrot.slane %v171_v50, 1 }
  0xb7   :  { %v783_v22 = vsel %vm453_vm7, %v782_v7, %v781_v53  ;;  %v188_v16 = vrot.slane %v172_v18, 1  ;;  %v189_v17 = vrot.slane %v173_v19, 1  ;;  %v190_v25 = vrot.slane %v174_v60, 1  ;;  %v3594_v60 = vld [vmem:[#allocation7 + $0x38] ss:$12 sps:$4 sm:$0xff]  }
  0xb8   :  { %786 = vst.msk [vmem:[#allocation2 + $0x8] sm:$0xff] %vm785_vm8, %v783_v22  ;;  %3434 = vmatpush3.bf16.msra.mxu0 %v3585_v30  ;;  %v191_v8 = vrot.slane %v175_v32, 1  ;;  %v192_v29 = vrot.slane %v176_v20, 1  ;;  %v201_v3 = vadd.f32 %v185_v61, %v129_v2  ;;  %v202_v12 = vadd.f32 %v186_v21, %v130_v57  ;;  %v3591_v57 = vld [vmem:[#allocation7 + $0x50] ss:$12 sps:$4 sm:$0xff]  }
  0xb9   :  { %v203_v4 = vadd.f32 %v187_v36, %v131_v39  ;;  %v204_v24 = vadd.f32 %v188_v16, %v132_v46  ;;  %v205_v40 = vadd.f32 %v189_v17, %v133_v54  ;;  %v206_v26 = vadd.f32 %v190_v25, %v134_v56  ;;  %3435 = vmatprep.subr.bf16.mxu0 %v3587_v14  ;;  %v3593_v54 = vld [vmem:[#allocation7 + $0xf8] ss:$12 sps:$4 sm:$0xff]   ;;  %v3596_v21 = vld [vmem:[#allocation7 + $0xe0] ss:$12 sps:$4 sm:$0xff]  }
  0xba   :  { %v207_v45 = vadd.f32 %v191_v8, %v135_v42  ;;  %v208_v9 = vadd.f32 %v192_v29, %v136_v62  ;;  %v257_v5 = vmul.f32 %v4588_v10, %v4384_v27  ;;  %v258_v33 = vmul.f32 %v4596_v38, %v4384_v27 }
  0xbb   :  { %v259_v43 = vmul.f32 %v4603_v58, %v4384_v27  ;;  %v260_v34 = vmul.f32 %v4610_v41, %v4384_v27  ;;  %v261_v44 = vmul.f32 %v4618_v52, %v4384_v27  ;;  %v262_v6 = vmul.f32 %v4625_v55, %v4384_v27 }
  0xbc   :  { %v263_v35 = vmul.f32 %v4632_v51, %v4384_v27  ;;  %v264_v7 = vmul.f32 %v4640_v59, %v4384_v27  ;;  %v273_v2 = vrot.slane %v257_v5, 2  ;;  %v274_v37 = vrot.slane %v258_v33, 2  ;;  %3436 = vmatpush3.bf16.msra.mxu0 %v3588_v31 }
  0xbd   :  { %v275_v39 = vrot.slane %v259_v43, 2  ;;  %v276_v46 = vrot.slane %v260_v34, 2  ;;  %v277_v11 = vrot.slane %v261_v44, 2  ;;  %v278_v30 = vrot.slane %v262_v6, 2  ;;  %3437 = vmatprep.subr.bf16.mxu0 %v3590_v13  ;;  %v3606_v43 = vld [vmem:[#allocation10 + $0x154] ss:$24 sps:$4 sm:$0xff]  }
  0xbe   :  { %v279_v56 = vrot.slane %v263_v35, 2  ;;  %v280_v42 = vrot.slane %v264_v7, 2  ;;  %v289_v48 = vadd.f32 %v273_v2, %v201_v3  ;;  %v290_v62 = vadd.f32 %v274_v37, %v202_v12  ;;  %v3597_v3 = vld [vmem:[#allocation7 + $0x20] ss:$12 sps:$4 sm:$0xff]  }
  0xbf   :  { %v1371_v63 = vld [vmem:[#allocation2 + $0x8] sm:$0xff]  ;;  %v291_v1 = vadd.f32 %v275_v39, %v203_v4  ;;  %v292_v14 = vadd.f32 %v276_v46, %v204_v24  ;;  %v293_v15 = vadd.f32 %v277_v11, %v205_v40  ;;  %v294_v50 = vadd.f32 %v278_v30, %v206_v26  ;;  %v3604_v30 = vld [vmem:[#allocation10 + $0x150] ss:$24 sps:$4 sm:$0xff]  }
  0xc0   :  { %v1374_v27 = vpack.c.bf16 %v1371_v63, %v1371_v63  ;;  %v295_v18 = vadd.f32 %v279_v56, %v207_v45  ;;  %v296_v19 = vadd.f32 %v280_v42, %v208_v9  ;;  %v345_v23 = vmul.f32 %v4588_v10, %v4386_v28  ;;  %3438 = vmatpush3.bf16.msra.mxu0 %v3591_v57  ;;  %v3600_v9 = vld [vmem:[#allocation7 + $0x8] ss:$12 sps:$4 sm:$0xff]   ;;  %v3586_v46 = vld [vmem:[#allocation7 + $0x230] ss:$12 sps:$4 sm:$0xff]   ;;  %v3589_v56 = vld [vmem:[#allocation7 + $0x218] ss:$12 sps:$4 sm:$0xff]  }
  0xc1   :  { %v346_v32 = vmul.f32 %v4596_v38, %v4386_v28  ;;  %v347_v20 = vmul.f32 %v4603_v58, %v4386_v28  ;;  %v348_v53 = vmul.f32 %v4610_v41, %v4386_v28  ;;  %v349_v61 = vmul.f32 %v4618_v52, %v4386_v28  ;;  %3439 = vmatprep.subr.bf16.mxu0 %v3593_v54  ;;  %v3609_v54 = vld [vmem:[#allocation10 + $0x124] ss:$24 sps:$4 sm:$0xff]   ;;  %v3607_v42 = vld [vmem:[#allocation10 + $0x120] ss:$24 sps:$4 sm:$0xff]   ;;  %v3610_v63 = vld [vmem:[#allocation10 + $0xf0] ss:$24 sps:$4 sm:$0xff]  }
  0xc2   :  { %1888 = vmatprep.mubr.bf16.mxu1 %v1374_v27  ;;  %v350_v10 = vmul.f32 %v4625_v55, %v4386_v28  ;;  %v351_v36 = vmul.f32 %v4632_v51, %v4386_v28  ;;  %v352_v38 = vmul.f32 %v4640_v59, %v4386_v28  ;;  %v361_v22 = vrot.slane %v345_v23, 3  ;;  %1970 = vmatprep.mubr.bf16.mxu0 %v1374_v27  ;;  %v3599_v51 = vld [vmem:[#allocation7 + $0xc8] ss:$12 sps:$4 sm:$0xff]   ;;  %v3598_v27 = vld [vmem:[#allocation7 + $0x1d0] ss:$12 sps:$4 sm:$0xff]  }
  0xc3   :  { %v362_v58 = vrot.slane %v346_v32, 3  ;;  %v363_v16 = vrot.slane %v347_v20, 3  ;;  %v364_v41 = vrot.slane %v348_v53, 3  ;;  %v365_v17 = vrot.slane %v349_v61, 3  ;;  %v3601_v23 = vld [vmem:[#allocation7 + $0x1b8] ss:$12 sps:$4 sm:$0xff]  }
  0xc4   :  { %v366_v25 = vrot.slane %v350_v10, 3  ;;  %v367_v52 = vrot.slane %v351_v36, 3  ;;  %v368_v8 = vrot.slane %v352_v38, 3  ;;  %v377_v29 = vadd.f32 %v361_v22, %v289_v48  ;;  %3440 = vmatpush3.bf16.msra.mxu0 %v3594_v60  ;;  %v3612_v48 = vld [vmem:[#allocation10 + $0xf4] ss:$24 sps:$4 sm:$0xff]  }
  0xc5   :  { %v378_v12 = vadd.f32 %v362_v58, %v290_v62  ;;  %v379_v55 = vadd.f32 %v363_v16, %v291_v1  ;;  %v380_v31 = vadd.f32 %v364_v41, %v292_v14  ;;  %v381_v4 = vadd.f32 %v365_v17, %v293_v15  ;;  %3441 = vmatprep.subr.bf16.mxu0 %v3596_v21  ;;  %v3592_v62 = vld [vmem:[#allocation7 + $0x200] ss:$12 sps:$4 sm:$0xff]   ;;  %v3615_v1 = vld [vmem:[#allocation10 + $0xc4] ss:$24 sps:$4 sm:$0xff]   ;;  %v3595_v14 = vld [vmem:[#allocation7 + $0x1e8] ss:$12 sps:$4 sm:$0xff]  }
  0xc6   :  { %v382_v24 = vadd.f32 %v366_v25, %v294_v50  ;;  %v383_v28 = vadd.f32 %v367_v52, %v295_v18  ;;  %v384_v59 = vadd.f32 %v368_v8, %v296_v19  ;;  %v3613_v15 = vld [vmem:[#allocation10 + $0xc0] ss:$24 sps:$4 sm:$0xff]   ;;  %v3618_v50 = vld [vmem:[#allocation10 + $0x94] ss:$24 sps:$4 sm:$0xff]   ;;  %v3616_v18 = vld [vmem:[#allocation10 + $0x90] ss:$24 sps:$4 sm:$0xff]  }
  0xc7   :  { %v434_v40 = vrot.slane %v378_v12, 7  ;;  %v437_v26 = vrot.slane %v379_v55, 6  ;;  %v440_v13 = vrot.slane %v380_v31, 5  ;;  %v443_v45 = vrot.slane %v381_v4, 4  ;;  %v3621_v19 = vld [vmem:[#allocation10 + $0x64] ss:$24 sps:$4 sm:$0xff]  }
  0xc8   :  { %3442 = vmatpush3.bf16.msra.mxu0 %v3597_v3  ;;  %v446_v33 = vrot.slane %v382_v24, 3  ;;  %v449_v44 = vrot.slane %v383_v28, 2  ;;  %v452_v35 = vrot.slane %v384_v59, 1  ;;  %v3619_v60 = vld [vmem:[#allocation10 + $0x60] ss:$24 sps:$4 sm:$0xff]  }
  0xc9   :  { %v436_v5 = vsel %vm435_vm1, %v434_v40, %v377_v29  ;;  %3443 = vmatprep.subr.bf16.mxu0 %v3599_v51  ;;  %v3624_v32 = vld [vmem:[#allocation10 + $0x34] ss:$24 sps:$4 sm:$0xff]   ;;  %v3622_v53 = vld [vmem:[#allocation10 + $0x30] ss:$24 sps:$4 sm:$0xff]   ;;  %v3627_v61 = vld [vmem:[#allocation10 + $0x4] ss:$24 sps:$4 sm:$0xff]  }
  0xca   :  { %v439_v34 = vsel %vm438_vm2, %v437_v26, %v436_v5  ;;  %v3602_v20 = vld [vmem:[#allocation7 + $0x1a0] ss:$12 sps:$4 sm:$0xff]   ;;  %v3603_v21 = vld [vmem:[#allocation7 + $0x188] ss:$12 sps:$4 sm:$0xff]   ;;  %v3633_v22 = vld [vmem:[#allocation10 + $0x2a4] ss:$24 sps:$4 sm:$0xff]  }
  0xcb   :  { %v442_v6 = vsel %vm441_vm3, %v440_v13, %v439_v34  ;;  %v3625_v10 = vld [vmem:[#allocation10] ss:$24 sps:$4 sm:$0xff]   ;;  %v3630_v36 = vld [vmem:[#allocation10 + $0x2d4] ss:$24 sps:$4 sm:$0xff]   ;;  %v3628_v38 = vld [vmem:[#allocation10 + $0x2d0] ss:$24 sps:$4 sm:$0xff]  }
  0xcc   :  { %v445_v7 = vsel %vm444_vm4, %v443_v45, %v442_v6  ;;  %3444 = vmatpush3.bf16.msra.mxu0 %v3600_v9  ;;  %v3631_v58 = vld [vmem:[#allocation10 + $0x2a0] ss:$24 sps:$4 sm:$0xff]   ;;  %v3636_v16 = vld [vmem:[#allocation10 + $0x274] ss:$24 sps:$4 sm:$0xff]   ;;  %v3634_v41 = vld [vmem:[#allocation10 + $0x270] ss:$24 sps:$4 sm:$0xff]  }
  0xcd   :  { %v448_v2 = vsel %vm447_vm5, %v446_v33, %v445_v7  ;;  %2888 = vmatprep.subr.bf16.mxu0 %v3606_v43  ;;  %v3637_v17 = vld [vmem:[#allocation10 + $0x240] ss:$24 sps:$4 sm:$0xff]   ;;  %v3642_v25 = vld [vmem:[#allocation10 + $0x214] ss:$24 sps:$4 sm:$0xff]   ;;  %v3640_v52 = vld [vmem:[#allocation10 + $0x210] ss:$24 sps:$4 sm:$0xff]  }
  0xce   :  { %v451_v37 = vsel %vm450_vm6, %v449_v44, %v448_v2  ;;  %v3645_v8 = vld [vmem:[#allocation10 + $0x1e4] ss:$24 sps:$4 sm:$0xff]   ;;  %v3648_v29 = vld [vmem:[#allocation10 + $0x1b4] ss:$24 sps:$4 sm:$0xff]   ;;  %v3646_v3 = vld [vmem:[#allocation10 + $0x1b0] ss:$24 sps:$4 sm:$0xff]  }
  0xcf   :  { %v454_v57 = vsel %vm453_vm7, %v452_v35, %v451_v37  ;;  %v3651_v12 = vld [vmem:[#allocation10 + $0x184] ss:$24 sps:$4 sm:$0xff]   ;;  %v3649_v55 = vld [vmem:[#allocation10 + $0x180] ss:$24 sps:$4 sm:$0xff]   ;;  %v3654_v31 = vld [vmem:[#allocation10 + $0x454] ss:$24 sps:$4 sm:$0xff]  }
  0xd0   :  { %457 = vst.msk [vmem:[#allocation2] sm:$0xff] %vm456_vm10, %v454_v57  ;;  %v3652_v4 = vld [vmem:[#allocation10 + $0x450] ss:$24 sps:$4 sm:$0xff]   ;;  %v3657_v24 = vld [vmem:[#allocation10 + $0x45c] ss:$24 sps:$4 sm:$0xff]  }
  0xd1   :  { %v3660_v59 = vld [vmem:[#allocation10 + $0x424] ss:$24 sps:$4 sm:$0xff]   ;;  %v3658_v40 = vld [vmem:[#allocation10 + $0x420] ss:$24 sps:$4 sm:$0xff]   ;;  %v3664_v26 = vld [vmem:[#allocation10 + $0x3f0] ss:$24 sps:$4 sm:$0xff]  }
  0xd2   :  { %v3666_v13 = vld [vmem:[#allocation10 + $0x3f4] ss:$24 sps:$4 sm:$0xff]   ;;  %v3670_v45 = vld [vmem:[#allocation10 + $0x3c0] ss:$24 sps:$4 sm:$0xff]   ;;  %v3672_v9 = vld [vmem:[#allocation10 + $0x3c4] ss:$24 sps:$4 sm:$0xff]  }
  0xd3   :  { %v3676_v5 = vld [vmem:[#allocation10 + $0x390] ss:$24 sps:$4 sm:$0xff]   ;;  %v3678_v33 = vld [vmem:[#allocation10 + $0x394] ss:$24 sps:$4 sm:$0xff]   ;;  %v3682_v43 = vld [vmem:[#allocation10 + $0x360] ss:$24 sps:$4 sm:$0xff]  }
  0xd4   :  { %v3684_v34 = vld [vmem:[#allocation10 + $0x364] ss:$24 sps:$4 sm:$0xff]   ;;  %v3688_v44 = vld [vmem:[#allocation10 + $0x330] ss:$24 sps:$4 sm:$0xff]   ;;  %v3690_v6 = vld [vmem:[#allocation10 + $0x334] ss:$24 sps:$4 sm:$0xff]  }
  0xd5   :  { %v3696_v2 = vld [vmem:[#allocation10 + $0x304] ss:$24 sps:$4 sm:$0xff]   ;;  %v3694_v37 = vld [vmem:[#allocation10 + $0x300] ss:$24 sps:$4 sm:$0xff]  }
  0xd6   :  { %v3702_v57 = vld [vmem:[#allocation10 + $0x15c] ss:$24 sps:$4 sm:$0xff]  }
  0xd7   :  { %v1370_v39 = vld [vmem:[#allocation2] sm:$0xff] }
  0xd8   :  { %v1373_v11 = vpack.c.bf16 %v1370_v39, %v1370_v39 }
  0xda   :  { %1889 = vmatmul.mubr.bf16.vlgmr.msra.gmra.mxu1 %v1373_v11  ;;  %1971 = vmatmul.mubr.bf16.vlgmr.msra.gmra.mxu0 %v1373_v11 }
  0xdb   :  { %3476 = vmatpush3.bf16.msra.mxu1 %v3586_v46  ;;  %3491 = vmatprep.mubr.msk.bf16.mxu1 %vm3924_vm0, %v3923_v0 }
  0xdc   :  { %3477 = vmatprep.subr.bf16.mxu1 %v3923_v0  ;;  %2889 = vmatpush1.bf16.msra.mxu0 %v3604_v30 }
  0xdd   :  { %2890 = vmatprep.subr.bf16.mxu0 %v3609_v54 }
  0xdf   :  { %3478 = vmatpush3.bf16.msra.mxu1 %v3589_v56 }
  0xe0   :  { %3479 = vmatprep.subr.bf16.mxu1 %v3923_v0  ;;  %2891 = vmatpush1.bf16.msra.mxu0 %v3607_v42 }
  0xe1   :  { %2892 = vmatprep.subr.bf16.mxu0 %v3612_v48 }
  0xe3   :  { %3480 = vmatpush3.bf16.msra.mxu1 %v3592_v62 }
  0xe4   :  { %3481 = vmatprep.subr.bf16.mxu1 %v3923_v0  ;;  %2893 = vmatpush1.bf16.msra.mxu0 %v3610_v63 }
  0xe5   :  { %2894 = vmatprep.subr.bf16.mxu0 %v3615_v1 }
  0xe7   :  { %3482 = vmatpush3.bf16.msra.mxu1 %v3595_v14 }
  0xe8   :  { %3483 = vmatprep.subr.bf16.mxu1 %v3923_v0  ;;  %2895 = vmatpush1.bf16.msra.mxu0 %v3613_v15 }
  0xe9   :  { %2896 = vmatprep.subr.bf16.mxu0 %v3618_v50 }
  0xeb   :  { %3484 = vmatpush3.bf16.msra.mxu1 %v3598_v27 }
  0xec   :  { %3485 = vmatprep.subr.bf16.mxu1 %v3923_v0  ;;  %2897 = vmatpush1.bf16.msra.mxu0 %v3616_v18 }
  0xed   :  { %2898 = vmatprep.subr.bf16.mxu0 %v3621_v19 }
  0xef   :  { %3486 = vmatpush3.bf16.msra.mxu1 %v3601_v23 }
  0xf0   :  { %3487 = vmatprep.subr.bf16.mxu1 %v3923_v0  ;;  %2899 = vmatpush1.bf16.msra.mxu0 %v3619_v60 }
  0xf1   :  { %2900 = vmatprep.subr.bf16.mxu0 %v3624_v32  ;;  %v3655_v32 = vld [vmem:[#allocation10 + $0x458] ss:$24 sps:$4 sm:$0xff]  }
  0xf3   :  { %3488 = vmatpush3.bf16.msra.mxu1 %v3602_v20 }
  0xf4   :  { %3489 = vmatprep.subr.bf16.mxu1 %v3923_v0  ;;  %2901 = vmatpush1.bf16.msra.mxu0 %v3622_v53  ;;  %v3639_v0 = vld [vmem:[#allocation10 + $0x244] ss:$24 sps:$4 sm:$0xff]  }
  0xf5   :  { %2902 = vmatprep.subr.bf16.mxu0 %v3627_v61  ;;  %v3663_v53 = vld [vmem:[#allocation10 + $0x42c] ss:$24 sps:$4 sm:$0xff]   ;;  %v3661_v61 = vld [vmem:[#allocation10 + $0x428] ss:$24 sps:$4 sm:$0xff]  }
  0xf7   :  { %3490 = vmatpush3.bf16.msra.mxu1 %v3603_v21  ;;  %v3669_v21 = vld [vmem:[#allocation10 + $0x3fc] ss:$24 sps:$4 sm:$0xff]  }
  0xf8   :  { %2903 = vmatpush1.bf16.msra.mxu0 %v3625_v10  ;;  %2929 = vmatprep.subr.bf16.mxu1 %v3654_v31  ;;  %v3667_v10 = vld [vmem:[#allocation10 + $0x3f8] ss:$24 sps:$4 sm:$0xff]  }
  0xf9   :  { %2904 = vmatprep.subr.bf16.mxu0 %v3630_v36  ;;  %v3675_v36 = vld [vmem:[#allocation10 + $0x3cc] ss:$24 sps:$4 sm:$0xff]   ;;  %v3700_v31 = vld [vmem:[#allocation10 + $0x158] ss:$24 sps:$4 sm:$0xff]  }
  0xfa   :  { %3492 = vmatmul.mubr.bf16.vlgmr.msra.gmra.mxu1 %v4563_v49  ;;  %v3643_v49 = vld [vmem:[#allocation10 + $0x1e0] ss:$24 sps:$4 sm:$0xff]  }
  0xfb   :  { %2961 = vmatprep.mubr.bf16.mxu1 %v3925_v47  ;;  %2930 = vmatpush1.bf16.msra.mxu1 %v3652_v4 }
  0xfc   :  { %2905 = vmatpush2.bf16.msra.mxu0 %v3628_v38  ;;  %2931 = vmatprep.subr.bf16.mxu1 %v3660_v59  ;;  %v3673_v38 = vld [vmem:[#allocation10 + $0x3c8] ss:$24 sps:$4 sm:$0xff]  }
  0xfd   :  { %2906 = vmatprep.subr.bf16.mxu0 %v3633_v22  ;;  %v3681_v22 = vld [vmem:[#allocation10 + $0x39c] ss:$24 sps:$4 sm:$0xff]  }
  0xff   :  { %2932 = vmatpush1.bf16.msra.mxu1 %v3658_v40  ;;  %v3703_v40 = vld [vmem:[#allocation10 + $0x160] ss:$24 sps:$4 sm:$0xff]  }
 0x100   :  { %2907 = vmatpush2.bf16.msra.mxu0 %v3631_v58  ;;  %2933 = vmatprep.subr.bf16.mxu1 %v3666_v13  ;;  %v3679_v58 = vld [vmem:[#allocation10 + $0x398] ss:$24 sps:$4 sm:$0xff]   ;;  %v3711_v13 = vld [vmem:[#allocation10 + $0x134] ss:$24 sps:$4 sm:$0xff]  }
 0x101   :  { %2908 = vmatprep.subr.bf16.mxu0 %v3636_v16  ;;  %v3687_v16 = vld [vmem:[#allocation10 + $0x36c] ss:$24 sps:$4 sm:$0xff]  }
 0x103   :  { %2934 = vmatpush1.bf16.msra.mxu1 %v3664_v26  ;;  %v3706_v26 = vld [vmem:[#allocation10 + $0x128] ss:$24 sps:$4 sm:$0xff]  }
 0x104   :  { %2909 = vmatpush2.bf16.msra.mxu0 %v3634_v41  ;;  %2935 = vmatprep.subr.bf16.mxu1 %v3672_v9  ;;  %v3685_v41 = vld [vmem:[#allocation10 + $0x368] ss:$24 sps:$4 sm:$0xff]  }
 0x105   :  { %2910 = vmatprep.subr.bf16.mxu0 %v3639_v0  ;;  %v3693_v0 = vld [vmem:[#allocation10 + $0x33c] ss:$24 sps:$4 sm:$0xff]   ;;  %v3709_v9 = vld [vmem:[#allocation10 + $0x130] ss:$24 sps:$4 sm:$0xff]  }
 0x107   :  { %2936 = vmatpush1.bf16.msra.mxu1 %v3670_v45  ;;  %v3714_v45 = vld [vmem:[#allocation10 + $0xfc] ss:$24 sps:$4 sm:$0xff]  }
 0x108   :  { %2911 = vmatpush2.bf16.msra.mxu0 %v3637_v17  ;;  %2937 = vmatprep.subr.bf16.mxu1 %v3678_v33  ;;  %v3717_v33 = vld [vmem:[#allocation10 + $0x104] ss:$24 sps:$4 sm:$0xff]  }
 0x109   :  { %2912 = vmatprep.subr.bf16.mxu0 %v3642_v25  ;;  %v3691_v25 = vld [vmem:[#allocation10 + $0x338] ss:$24 sps:$4 sm:$0xff]  }
 0x10b   :  { %2938 = vmatpush1.bf16.msra.mxu1 %v3676_v5  ;;  %v3712_v5 = vld [vmem:[#allocation10 + $0xf8] ss:$24 sps:$4 sm:$0xff]  }
 0x10c   :  { %2913 = vmatpush2.bf16.msra.mxu0 %v3640_v52  ;;  %2939 = vmatprep.subr.bf16.mxu1 %v3684_v34  ;;  %v3715_v34 = vld [vmem:[#allocation10 + $0x100] ss:$24 sps:$4 sm:$0xff]  }
 0x10d   :  { %2914 = vmatprep.subr.bf16.mxu0 %v3645_v8  ;;  %v3699_v8 = vld [vmem:[#allocation10 + $0x30c] ss:$24 sps:$4 sm:$0xff]  }
 0x10f   :  { %2940 = vmatpush1.bf16.msra.mxu1 %v3682_v43  ;;  %v3720_v43 = vld [vmem:[#allocation10 + $0xcc] ss:$24 sps:$4 sm:$0xff]  }
 0x110   :  { %2915 = vmatpush2.bf16.msra.mxu0 %v3643_v49  ;;  %2941 = vmatprep.subr.bf16.mxu1 %v3690_v6  ;;  %v3723_v6 = vld [vmem:[#allocation10 + $0xd4] ss:$24 sps:$4 sm:$0xff]  }
 0x111   :  { %2916 = vmatprep.subr.bf16.mxu0 %v3648_v29 }
 0x113   :  { %2942 = vmatpush1.bf16.msra.mxu1 %v3688_v44  ;;  %v3718_v44 = vld [vmem:[#allocation10 + $0xc8] ss:$24 sps:$4 sm:$0xff]  }
 0x114   :  { %2917 = vmatpush2.bf16.msra.mxu0 %v3646_v3  ;;  %2943 = vmatprep.subr.bf16.mxu1 %v3696_v2  ;;  %v3721_v2 = vld [vmem:[#allocation10 + $0xd0] ss:$24 sps:$4 sm:$0xff]  }
 0x115   :  { %2918 = vmatprep.subr.bf16.mxu0 %v3651_v12  ;;  %v3697_v12 = vld [vmem:[#allocation10 + $0x308] ss:$24 sps:$4 sm:$0xff]  }
 0x117   :  { %2944 = vmatpush1.bf16.msra.mxu1 %v3694_v37  ;;  %v3724_v37 = vld [vmem:[#allocation10 + $0x98] ss:$24 sps:$4 sm:$0xff]  }
 0x118   :  { %2919 = vmatpush2.bf16.msra.mxu0 %v3649_v55  ;;  %2970 = vmatprep.subr.bf16.mxu1 %v3702_v57  ;;  %v3729_v57 = vld [vmem:[#allocation10 + $0xa4] ss:$24 sps:$4 sm:$0xff]  }
 0x119   :  { %3011 = vmatprep.subr.bf16.mxu0 %v3657_v24  ;;  %v3705_v24 = vld [vmem:[#allocation10 + $0x164] ss:$24 sps:$4 sm:$0xff]  }
 0x120   :  { %v4716_v51 = vpop.f32.mrf.mxu1 }
 0x122   :  { %v3469_v28 = vpop.f32.mrf.mxu1 }
 0x123   :  { %v3708_v28 = vld [vmem:[#allocation10 + $0x12c] ss:$24 sps:$4 sm:$0xff]  }
 0x137   :  { %v4718_v35 = vpop.f32.mrf.mxu0 }
 0x139   :  { %v3464_v7 = vpop.f32.mrf.mxu0 }
 0x13a   :  { %v3726_v7 = vld [vmem:[#allocation10 + $0x9c] ss:$24 sps:$4 sm:$0xff]  }
 0x14f   :  { %v4720_v39 = vpop.f32.mrf.mxu0 }
 0x151   :  { %v3474_v46 = vpop.f32.mrf.mxu0 }
 0x152   :  { %v3732_v46 = vld [vmem:[#allocation10 + $0x6c] ss:$24 sps:$4 sm:$0xff]  }
 0x16f   :  { %v1931_v11 = vpop.f32.mrf.mxu0 }
 0x171   :  { %v1933_v30 = vpop.f32.mrf.mxu0 }
 0x173   :  { %v1935_v54 = vpop.f32.mrf.mxu0 }
 0x174   :  { %v3735_v54 = vld [vmem:[#allocation10 + $0x74] ss:$24 sps:$4 sm:$0xff]  }
 0x175   :  { %v1936_v56 = vpop.f32.mrf.mxu0 }
 0x176   :  { %v3738_v56 = vld [vmem:[#allocation10 + $0x3c] ss:$24 sps:$4 sm:$0xff]  }
 0x19a   :  { %v1890_v42 = vpop.f32.mrf.mxu1  ;;  %v3445_v48 = vpop.f32.mrf.mxu0 }
 0x19b   :  { %v1932_v62 = vadd.f32 %v1931_v11, %v1890_v42  ;;  %v3727_v11 = vld [vmem:[#allocation10 + $0xa0] ss:$24 sps:$4 sm:$0xff]   ;;  %v3733_v42 = vld [vmem:[#allocation10 + $0x70] ss:$24 sps:$4 sm:$0xff]  }
 0x19c   :  { %v1892_v63 = vpop.f32.mrf.mxu1  ;;  %v3446_v1 = vpop.f32.mrf.mxu0 }
 0x19d   :  { %v1934_v14 = vadd.f32 %v1933_v30, %v1892_v63  ;;  %v2018_v15 = vmax.f32 %v1932_v62, 0.0  ;;  %v3447_v17 = vadd.f32 %v3446_v1, %v3445_v48  ;;  %v3730_v30 = vld [vmem:[#allocation10 + $0x68] ss:$24 sps:$4 sm:$0xff]   ;;  %v3736_v48 = vld [vmem:[#allocation10 + $0x38] ss:$24 sps:$4 sm:$0xff]  }
 0x19e   :  { %v1894_v50 = vpop.f32.mrf.mxu1  ;;  %v3448_v27 = vpop.f32.mrf.mxu0  ;;  %v3741_v62 = vld [vmem:[#allocation10 + $0x44] ss:$24 sps:$4 sm:$0xff]   ;;  %v3739_v1 = vld [vmem:[#allocation10 + $0x40] ss:$24 sps:$4 sm:$0xff]  }
 0x19f   :  { %v2019_v18 = vmax.f32 %v1934_v14, 0.0  ;;  %v4722_v20 = vpack.c.bf16 %v2018_v15, %v2018_v15  ;;  %v3744_v63 = vld [vmem:[#allocation10 + $0xc] ss:$24 sps:$4 sm:$0xff]   ;;  %v3742_v14 = vld [vmem:[#allocation10 + $0x8] ss:$24 sps:$4 sm:$0xff]  }
 0x1a0   :  { %v1895_v19 = vpop.f32.mrf.mxu1  ;;  %v3449_v23 = vpop.f32.mrf.mxu0  ;;  %v3747_v15 = vld [vmem:[#allocation10 + $0x14] ss:$24 sps:$4 sm:$0xff]   ;;  %v3745_v27 = vld [vmem:[#allocation10 + $0x10] ss:$24 sps:$4 sm:$0xff]  }
 0x1a1   :  { %v2022_v60 = vpack.c.bf16 %v2019_v18, %v2019_v18  ;;  %v3750_v50 = vld [vmem:[#allocation10 + $0x2dc] ss:$24 sps:$4 sm:$0xff]   ;;  %v3748_v18 = vld [vmem:[#allocation10 + $0x2d8] ss:$24 sps:$4 sm:$0xff]   ;;  %v3756_v23 = vld [vmem:[#allocation10 + $0x2ac] ss:$24 sps:$4 sm:$0xff]  }
 0x1a2   :  { %v3753_v19 = vld [vmem:[#allocation10 + $0x2e4] ss:$24 sps:$4 sm:$0xff]  }
 0x1a3   :  { %2920 = vmatprep.mubr.bf16.mxu0 %v2022_v60 }
 0x1a4   :  { %2921 = vmatmul.mubr.bf16.vlgmr.msra.gmra.mxu0 %v4722_v20 }
 0x1a5   :  { %3012 = vmatpush1.bf16.msra.mxu0 %v3655_v32  ;;  %3043 = vmatprep.mubr.bf16.mxu0 %v3925_v47  ;;  %v3754_v32 = vld [vmem:[#allocation10 + $0x2a8] ss:$24 sps:$4 sm:$0xff]  }
 0x1a6   :  { %3013 = vmatprep.subr.bf16.mxu0 %v3663_v53  ;;  %v3759_v53 = vld [vmem:[#allocation10 + $0x2b4] ss:$24 sps:$4 sm:$0xff]  }
 0x1a9   :  { %3014 = vmatpush1.bf16.msra.mxu0 %v3661_v61  ;;  %v3762_v61 = vld [vmem:[#allocation10 + $0x27c] ss:$24 sps:$4 sm:$0xff]  }
 0x1aa   :  { %3015 = vmatprep.subr.bf16.mxu0 %v3669_v21  ;;  %v3757_v21 = vld [vmem:[#allocation10 + $0x2b0] ss:$24 sps:$4 sm:$0xff]  }
 0x1ad   :  { %3016 = vmatpush1.bf16.msra.mxu0 %v3667_v10  ;;  %v3760_v10 = vld [vmem:[#allocation10 + $0x278] ss:$24 sps:$4 sm:$0xff]  }
 0x1ae   :  { %3017 = vmatprep.subr.bf16.mxu0 %v3675_v36  ;;  %v3765_v36 = vld [vmem:[#allocation10 + $0x284] ss:$24 sps:$4 sm:$0xff]  }
 0x1b1   :  { %3018 = vmatpush1.bf16.msra.mxu0 %v3673_v38  ;;  %v3768_v38 = vld [vmem:[#allocation10 + $0x24c] ss:$24 sps:$4 sm:$0xff]  }
 0x1b2   :  { %3019 = vmatprep.subr.bf16.mxu0 %v3681_v22  ;;  %v3763_v22 = vld [vmem:[#allocation10 + $0x280] ss:$24 sps:$4 sm:$0xff]  }
 0x1b5   :  { %3020 = vmatpush1.bf16.msra.mxu0 %v3679_v58  ;;  %v3766_v58 = vld [vmem:[#allocation10 + $0x248] ss:$24 sps:$4 sm:$0xff]  }
 0x1b6   :  { %3021 = vmatprep.subr.bf16.mxu0 %v3687_v16  ;;  %v3771_v16 = vld [vmem:[#allocation10 + $0x254] ss:$24 sps:$4 sm:$0xff]  }
 0x1b9   :  { %3022 = vmatpush1.bf16.msra.mxu0 %v3685_v41  ;;  %v3774_v41 = vld [vmem:[#allocation10 + $0x21c] ss:$24 sps:$4 sm:$0xff]  }
 0x1ba   :  { %v2012_v52 = vpop.f32.mrf.mxu1  ;;  %3023 = vmatprep.subr.bf16.mxu0 %v3693_v0  ;;  %v3769_v0 = vld [vmem:[#allocation10 + $0x250] ss:$24 sps:$4 sm:$0xff]  }
 0x1bb   :  { %v2013_v49 = vadd.f32 %v3447_v17, %v2012_v52  ;;  %v3772_v17 = vld [vmem:[#allocation10 + $0x218] ss:$24 sps:$4 sm:$0xff]   ;;  %v3780_v52 = vld [vmem:[#allocation10 + $0x1ec] ss:$24 sps:$4 sm:$0xff]  }
 0x1bc   :  { %v3493_v29 = vpop.f32.mrf.mxu1 }
 0x1bd   :  { %v2020_v3 = vmax.f32 %v2013_v49, 0.0  ;;  %3024 = vmatpush1.bf16.msra.mxu0 %v3691_v25  ;;  %v3777_v25 = vld [vmem:[#allocation10 + $0x224] ss:$24 sps:$4 sm:$0xff]   ;;  %v3778_v49 = vld [vmem:[#allocation10 + $0x1e8] ss:$24 sps:$4 sm:$0xff]  }
 0x1be   :  { %v2015_v55 = vpop.f32.mrf.mxu1  ;;  %3025 = vmatprep.subr.bf16.mxu0 %v3699_v8  ;;  %v3775_v8 = vld [vmem:[#allocation10 + $0x220] ss:$24 sps:$4 sm:$0xff]   ;;  %v3783_v29 = vld [vmem:[#allocation10 + $0x1f4] ss:$24 sps:$4 sm:$0xff]  }
 0x1bf   :  { %v4726_v4 = vpack.c.bf16 %v2020_v3, %v2020_v3  ;;  %v3786_v3 = vld [vmem:[#allocation10 + $0x1bc] ss:$24 sps:$4 sm:$0xff]   ;;  %v3784_v55 = vld [vmem:[#allocation10 + $0x1b8] ss:$24 sps:$4 sm:$0xff]  }
 0x1c0   :  { %v3494_v59 = vpop.f32.mrf.mxu1 }
 0x1c1   :  { %3026 = vmatpush1.bf16.msra.mxu0 %v3697_v12  ;;  %2962 = vmatmul.mubr.bf16.vlgmr.msra.gmra.mxu1 %v4726_v4  ;;  %v3781_v12 = vld [vmem:[#allocation10 + $0x1f0] ss:$24 sps:$4 sm:$0xff]  }
 0x1c2   :  { %2971 = vmatpush1.bf16.msra.mxu1 %v3700_v31  ;;  %3002 = vmatprep.mubr.bf16.mxu1 %v2022_v60  ;;  %v3789_v31 = vld [vmem:[#allocation10 + $0x1c4] ss:$24 sps:$4 sm:$0xff]   ;;  %v3790_v59 = vld [vmem:[#allocation10 + $0x188] ss:$24 sps:$4 sm:$0xff]  }
 0x1c3   :  { %3052 = vmatprep.subr.bf16.mxu0 %v3705_v24  ;;  %2972 = vmatprep.subr.bf16.mxu1 %v3708_v28  ;;  %v3792_v24 = vld [vmem:[#allocation10 + $0x18c] ss:$24 sps:$4 sm:$0xff]   ;;  %v3787_v28 = vld [vmem:[#allocation10 + $0x1c0] ss:$24 sps:$4 sm:$0xff]  }
 0x1c4   :  { %3044 = vmatmul.mubr.bf16.vlgmr.msra.gmra.mxu0 %v4726_v4 }
 0x1c5   :  { %3053 = vmatpush1.bf16.msra.mxu0 %v3703_v40  ;;  %3084 = vmatprep.mubr.bf16.mxu0 %v2022_v60  ;;  %v3751_v60 = vld [vmem:[#allocation10 + $0x2e0] ss:$24 sps:$4 sm:$0xff]   ;;  %v3795_v40 = vld [vmem:[#allocation10 + $0x194] ss:$24 sps:$4 sm:$0xff]  }
 0x1c6   :  { %2973 = vmatpush1.bf16.msra.mxu1 %v3706_v26  ;;  %3054 = vmatprep.subr.bf16.mxu0 %v3711_v13  ;;  %v3798_v26 = vld [vmem:[#allocation10 + $0x464] ss:$24 sps:$4 sm:$0xff]   ;;  %v3793_v13 = vld [vmem:[#allocation10 + $0x190] ss:$24 sps:$4 sm:$0xff]  }
 0x1c7   :  { %2974 = vmatprep.subr.bf16.mxu1 %v3714_v45  ;;  %v3796_v45 = vld [vmem:[#allocation10 + $0x460] ss:$24 sps:$4 sm:$0xff]  }
 0x1c9   :  { %3055 = vmatpush1.bf16.msra.mxu0 %v3709_v9  ;;  %v3801_v9 = vld [vmem:[#allocation10 + $0x434] ss:$24 sps:$4 sm:$0xff]  }
 0x1ca   :  { %2975 = vmatpush1.bf16.msra.mxu1 %v3712_v5  ;;  %3056 = vmatprep.subr.bf16.mxu0 %v3717_v33  ;;  %v3799_v5 = vld [vmem:[#allocation10 + $0x430] ss:$24 sps:$4 sm:$0xff]   ;;  %v3804_v33 = vld [vmem:[#allocation10 + $0x404] ss:$24 sps:$4 sm:$0xff]  }
 0x1cb   :  { %2976 = vmatprep.subr.bf16.mxu1 %v3720_v43  ;;  %v3802_v43 = vld [vmem:[#allocation10 + $0x400] ss:$24 sps:$4 sm:$0xff]  }
 0x1cd   :  { %3057 = vmatpush1.bf16.msra.mxu0 %v3715_v34  ;;  %v3807_v34 = vld [vmem:[#allocation10 + $0x3d4] ss:$24 sps:$4 sm:$0xff]  }
 0x1ce   :  { %2977 = vmatpush1.bf16.msra.mxu1 %v3718_v44  ;;  %3058 = vmatprep.subr.bf16.mxu0 %v3723_v6  ;;  %v3805_v44 = vld [vmem:[#allocation10 + $0x3d0] ss:$24 sps:$4 sm:$0xff]   ;;  %v3810_v6 = vld [vmem:[#allocation10 + $0x3a4] ss:$24 sps:$4 sm:$0xff]  }
 0x1cf   :  { %2978 = vmatprep.subr.bf16.mxu1 %v3726_v7  ;;  %v3808_v7 = vld [vmem:[#allocation10 + $0x3a0] ss:$24 sps:$4 sm:$0xff]  }
 0x1d1   :  { %3059 = vmatpush1.bf16.msra.mxu0 %v3721_v2  ;;  %v3813_v2 = vld [vmem:[#allocation10 + $0x374] ss:$24 sps:$4 sm:$0xff]  }
 0x1d2   :  { %2979 = vmatpush1.bf16.msra.mxu1 %v3724_v37  ;;  %3060 = vmatprep.subr.bf16.mxu0 %v3729_v57  ;;  %v3811_v37 = vld [vmem:[#allocation10 + $0x370] ss:$24 sps:$4 sm:$0xff]   ;;  %v3814_v57 = vld [vmem:[#allocation10 + $0x340] ss:$24 sps:$4 sm:$0xff]  }
 0x1d3   :  { %2980 = vmatprep.subr.bf16.mxu1 %v3732_v46  ;;  %v3817_v46 = vld [vmem:[#allocation10 + $0x310] ss:$24 sps:$4 sm:$0xff]  }
 0x1d5   :  { %3061 = vmatpush1.bf16.msra.mxu0 %v3727_v11 }
 0x1d6   :  { %2981 = vmatpush1.bf16.msra.mxu1 %v3730_v30  ;;  %3062 = vmatprep.subr.bf16.mxu0 %v3735_v54 }
 0x1d7   :  { %2982 = vmatprep.subr.bf16.mxu1 %v3738_v56 }
 0x1d9   :  { %3063 = vmatpush1.bf16.msra.mxu0 %v3733_v42 }
 0x1da   :  { %2983 = vmatpush1.bf16.msra.mxu1 %v3736_v48  ;;  %3064 = vmatprep.subr.bf16.mxu0 %v3741_v62 }
 0x1db   :  { %2984 = vmatprep.subr.bf16.mxu1 %v3744_v63 }
 0x1dd   :  { %3065 = vmatpush1.bf16.msra.mxu0 %v3739_v1 }
 0x1de   :  { %2985 = vmatpush1.bf16.msra.mxu1 %v3742_v14  ;;  %3066 = vmatprep.subr.bf16.mxu0 %v3747_v15 }
 0x1df   :  { %2986 = vmatprep.subr.bf16.mxu1 %v3750_v50 }
 0x1e1   :  { %3067 = vmatpush1.bf16.msra.mxu0 %v3745_v27 }
 0x1e2   :  { %2987 = vmatpush2.bf16.msra.mxu1 %v3748_v18  ;;  %3068 = vmatprep.subr.bf16.mxu0 %v3753_v19 }
 0x1e3   :  { %2988 = vmatprep.subr.bf16.mxu1 %v3756_v23 }
 0x1e5   :  { %3069 = vmatpush2.bf16.msra.mxu0 %v3751_v60 }
 0x1e6   :  { %2989 = vmatpush2.bf16.msra.mxu1 %v3754_v32  ;;  %3070 = vmatprep.subr.bf16.mxu0 %v3759_v53 }
 0x1e7   :  { %2990 = vmatprep.subr.bf16.mxu1 %v3762_v61 }
 0x1e9   :  { %3071 = vmatpush2.bf16.msra.mxu0 %v3757_v21 }
 0x1ea   :  { %2991 = vmatpush2.bf16.msra.mxu1 %v3760_v10  ;;  %3072 = vmatprep.subr.bf16.mxu0 %v3765_v36 }
 0x1eb   :  { %2992 = vmatprep.subr.bf16.mxu1 %v3768_v38 }
 0x1ed   :  { %3073 = vmatpush2.bf16.msra.mxu0 %v3763_v22 }
 0x1ee   :  { %2993 = vmatpush2.bf16.msra.mxu1 %v3766_v58  ;;  %3074 = vmatprep.subr.bf16.mxu0 %v3771_v16  ;;  %v3137_v58 = vld [vmem:[#allocation3] sm:$0xff] }
 0x1ef   :  { %2994 = vmatprep.subr.bf16.mxu1 %v3774_v41 }
 0x1f1   :  { %3075 = vmatpush2.bf16.msra.mxu0 %v3769_v0 }
 0x1f2   :  { %2995 = vmatpush2.bf16.msra.mxu1 %v3772_v17  ;;  %3076 = vmatprep.subr.bf16.mxu0 %v3777_v25 }
 0x1f3   :  { %2996 = vmatprep.subr.bf16.mxu1 %v3780_v52 }
 0x1f5   :  { %3077 = vmatpush2.bf16.msra.mxu0 %v3775_v8 }
 0x1f6   :  { %2997 = vmatpush2.bf16.msra.mxu1 %v3778_v49  ;;  %3078 = vmatprep.subr.bf16.mxu0 %v3783_v29 }
 0x1f7   :  { %2998 = vmatprep.subr.bf16.mxu1 %v3786_v3 }
 0x1f9   :  { %3079 = vmatpush2.bf16.msra.mxu0 %v3781_v12 }
 0x1fa   :  { %2999 = vmatpush2.bf16.msra.mxu1 %v3784_v55  ;;  %3080 = vmatprep.subr.bf16.mxu0 %v3789_v31 }
 0x1fb   :  { %3000 = vmatprep.subr.bf16.mxu1 %v3792_v24 }
 0x1fd   :  { %3081 = vmatpush2.bf16.msra.mxu0 %v3787_v28 }
 0x1fe   :  { %3001 = vmatpush2.bf16.msra.mxu1 %v3790_v59  ;;  %3082 = vmatprep.subr.bf16.mxu0 %v3795_v40 }
 0x1ff   :  { %3093 = vmatprep.subr.bf16.mxu1 %v3798_v26 }
 0x201   :  { %3003 = vmatmul.mubr.bf16.vlgmr.msra.gmra.mxu1 %v4722_v20  ;;  %3083 = vmatpush2.bf16.msra.mxu0 %v3793_v13  ;;  %v3138_v13 = vld [vmem:[#allocation3 + $0x8] sm:$0xff] }
 0x202   :  { %3094 = vmatpush1.bf16.msra.mxu1 %v3796_v45  ;;  %3125 = vmatprep.mubr.bf16.mxu1 %v3925_v47  ;;  %v3816_v47 = vld [vmem:[#allocation10 + $0x344] ss:$24 sps:$4 sm:$0xff]  }
 0x203   :  { %3095 = vmatprep.subr.bf16.mxu1 %v3801_v9  ;;  %v3139_v9 = vld [vmem:[#allocation3 + $0x10] sm:$0xff] }
 0x204   :  { %3085 = vmatmul.mubr.bf16.vlgmr.msra.gmra.mxu0 %v4722_v20  ;;  %v3819_v20 = vld [vmem:[#allocation10 + $0x314] ss:$24 sps:$4 sm:$0xff]  }
 0x206   :  { %3096 = vmatpush1.bf16.msra.mxu1 %v3799_v5 }
 0x207   :  { %3097 = vmatprep.subr.bf16.mxu1 %v3804_v33 }
 0x20a   :  { %3098 = vmatpush1.bf16.msra.mxu1 %v3802_v43 }
 0x20b   :  { %3099 = vmatprep.subr.bf16.mxu1 %v3807_v34 }
 0x20e   :  { %3100 = vmatpush1.bf16.msra.mxu1 %v3805_v44 }
 0x20f   :  { %3101 = vmatprep.subr.bf16.mxu1 %v3810_v6 }
 0x212   :  { %3102 = vmatpush1.bf16.msra.mxu1 %v3808_v7 }
 0x213   :  { %3103 = vmatprep.subr.bf16.mxu1 %v3813_v2 }
 0x216   :  { %3104 = vmatpush1.bf16.msra.mxu1 %v3811_v37 }
 0x217   :  { %3105 = vmatprep.subr.bf16.mxu1 %v3816_v47 }
 0x21a   :  { %3106 = vmatpush1.bf16.msra.mxu1 %v3814_v57 }
 0x21b   :  { %3107 = vmatprep.subr.bf16.mxu1 %v3819_v20 }
 0x21e   :  { %3108 = vmatpush1.bf16.msra.mxu1 %v3817_v46 }
 0x221   :  { %3126 = vmatmul.mubr.bf16.vlgmr.msra.gmra.mxu1 %v4726_v4 }
 0x264   :  { %v2922_v11 = vpop.f32.mrf.mxu0 }
 0x266   :  { %v2924_v30 = vpop.f32.mrf.mxu0 }
 0x268   :  { %v2926_v54 = vpop.f32.mrf.mxu0 }
 0x26a   :  { %v2927_v56 = vpop.f32.mrf.mxu0 }
 0x281   :  { %v2963_v42 = vpop.f32.mrf.mxu1 }
 0x282   :  { %v2964_v48 = vadd.f32 %v2963_v42, %v2922_v11 }
 0x283   :  { %v2965_v62 = vpop.f32.mrf.mxu1 }
 0x284   :  { %v2966_v63 = vadd.f32 %v2965_v62, %v2924_v30  ;;  %v3045_v1 = vpop.f32.mrf.mxu0  ;;  %v3143_v16 = vsub.f32 %v2964_v48, %v4718_v35  ;;  %v3149_v41 = vsub.f32 %v2964_v48, %v3137_v58 }
 0x285   :  { %v2967_v14 = vpop.f32.mrf.mxu1 }
 0x286   :  { %v3047_v15 = vpop.f32.mrf.mxu0  ;;  %v3146_v0 = vmul.f32 %v3143_v16, %v3143_v16  ;;  %v3152_v17 = vmul.f32 %v3149_v41, %v3149_v41  ;;  %v3144_v5 = vsub.f32 %v2966_v63, %v4716_v51  ;;  %v3150_v33 = vsub.f32 %v2966_v63, %v3138_v13 }
 0x287   :  { %v2968_v50 = vpop.f32.mrf.mxu1 }
 0x288   :  { %v3049_v27 = vpop.f32.mrf.mxu0  ;;  %v3155_v49 = vsub.f32 %v3146_v0, %v3152_v17  ;;  %v3147_v44 = vmul.f32 %v3144_v5, %v3144_v5  ;;  %v3153_v6 = vmul.f32 %v3150_v33, %v3150_v33 }
 0x28a   :  { %v3050_v18 = vpop.f32.mrf.mxu0  ;;  %v3156_v37 = vsub.f32 %v3147_v44, %v3153_v6 }
 0x2c1   :  { %v3004_v19 = vpop.f32.mrf.mxu1 }
 0x2c2   :  { %v3046_v45 = vadd.f32 %v3045_v1, %v3004_v19 }
 0x2c3   :  { %v3006_v23 = vpop.f32.mrf.mxu1 }
 0x2c4   :  { %v3048_v60 = vadd.f32 %v3047_v15, %v3006_v23  ;;  %v3086_v32 = vpop.f32.mrf.mxu0  ;;  %v3145_v43 = vsub.f32 %v3046_v45, %v4720_v39  ;;  %v3151_v34 = vsub.f32 %v3046_v45, %v3139_v9 }
 0x2c5   :  { %v3008_v53 = vpop.f32.mrf.mxu1 }
 0x2c6   :  { %3820 = vtanh.f32 %v3048_v60  ;;  %v3088_v4 = vpop.f32.mrf.mxu0  ;;  %v3148_v7 = vmul.f32 %v3145_v43, %v3145_v43  ;;  %v3154_v2 = vmul.f32 %v3151_v34, %v3151_v34 }
 0x2c7   :  { %v3009_v61 = vpop.f32.mrf.mxu1 }
 0x2c8   :  { %v3090_v21 = vpop.f32.mrf.mxu0  ;;  %v3157_v57 = vsub.f32 %v3148_v7, %v3154_v2 }
 0x2ca   :  { %v3091_v10 = vpop.f32.mrf.mxu0 }
 0x2d3   :  { %v3821_v36 = vpop.eup %3820 }
 0x2d4   :  { %v3158_v38 = vsub.f32 0.0, %v3821_v36 }
 0x2d6   :  { %v3161_v22 = vmul.f32 1.442695, %v3158_v38 }
 0x2d8   :  { %3822 = vpow2.f32 %v3161_v22 }
 0x2e1   :  { %v3127_v25 = vpop.f32.mrf.mxu1 }
 0x2e2   :  { %v3128_v52 = vadd.f32 %v3127_v25, %v3086_v32 }
 0x2e3   :  { %v3129_v8 = vpop.f32.mrf.mxu1 }
 0x2e4   :  { %3824 = vtanh.f32 %v3128_v52  ;;  %v3130_v29 = vadd.f32 %v3129_v8, %v3088_v4 }
 0x2e5   :  { %v3823_v3 = vpop.eup %3822  ;;  %v3131_v12 = vpop.f32.mrf.mxu1 }
 0x2e6   :  { %3826 = vtanh.f32 %v3130_v29  ;;  %v3167_v55 = vmul.f32 %v3823_v3, %v3155_v49 }
 0x2e7   :  { %v3132_v31 = vpop.f32.mrf.mxu1 }
 0x2f1   :  { %v3825_v24 = vpop.eup %3824 }
 0x2f2   :  { %v3159_v28 = vsub.f32 0.0, %v3825_v24 }
 0x2f3   :  { %v3827_v59 = vpop.eup %3826 }
 0x2f4   :  { %v3163_v40 = vmul.f32 1.442695, %v3159_v28  ;;  %v3160_v26 = vsub.f32 0.0, %v3827_v59 }
 0x2f6   :  { %3828 = vpow2.f32 %v3163_v40  ;;  %v3165_v35 = vmul.f32 1.442695, %v3160_v26 }
 0x2f8   :  { %3830 = vpow2.f32 %v3165_v35 }
 0x303   :  { %v3829_v47 = vpop.eup %3828 }
 0x304   :  { %v3168_v20 = vmul.f32 %v3829_v47, %v3156_v37 }
 0x305   :  { %v3831_v46 = vpop.eup %3830 }
 0x306   :  { %v3169_v11 = vmul.f32 %v3831_v46, %v3157_v57  ;;  %v3170_v30 = vadd.f32 %v3168_v20, %v3167_v55 }
 0x308   :  { %v3171_v54 = vadd.f32 %v3170_v30, %v3169_v11 }
 0x30a   :  { %3172 = vadd.xlane.f32.xlu0 %v3171_v54 }
 0x393   :  { %v3173_v56 = vpop.xlane.xlu0 %3172 }
 0x394   :  { %v3174_v42 = vrot.slane %v3173_v56, 4 }
 0x396   :  { %v3175_v51 = vadd.f32 %v3174_v42, %v3173_v56 }
 0x398   :  { %v3176_v48 = vrot.slane %v3175_v51, 2 }
 0x39a   :  { %v3177_v62 = vadd.f32 %v3176_v48, %v3175_v51 }
 0x39c   :  { %v3178_v39 = vrot.slane %v3177_v62, 1 }
 0x39e   :  { %v3179_v63 = vadd.f32 %v3178_v39, %v3177_v62 }
 0x3a0   :  { %3495 = vpush %v3179_v63 }
 0x3d1   :  { %s3496_s1 = spop %3495 }
 0x3d2   :  { %s3183_s14 = smul.f32 0.020833334, %s3496_s1 }
 0x3d4   :  { %3185 = sst [smem:[#allocation12]] %s3183_s14 }
 0x3d5   :  { %3193 = dma.smem_to_hbm %s3926_s15, 16, %s4747_s7, [#allocation9]  }
 0x3d6   :  { %3914 = dma.done.wait [#allocation9], 16  }
 0x3d7   :  { %3915 = vsyncadd [#allocation9], 4294967280 }
 0x3d8   :  { %3197 = sfence }
 0x3d9   :  { %3198 = vsyncpa [#allocation8], 1 }
 0x3da   :  { %3199 = vsyncpa [#allocation11], 1 }
 0x3db   :  { %3200 = vsyncpa [#allocation9], 1 }

</bundles_post_ra>
